<compile_context>
chip_gen: v7x
topology: tpu7x:2x2x1
jax: 0.10.0
libtpu: 0.0.40
codegen_flags: <defaults>
</compile_context>

<pallas_src>
import functools
import math

import jax
import jax.numpy as jnp
from jax import lax
from jax.experimental import pallas as pl
from jax.experimental.pallas import tpu as pltpu


def _round_up(x, m):
    return (x + m - 1) // m * m


def _supcon_kernel(row_lab_ref, col_lab_ref, fr_ref, fc_ref, out_ref,
                   m_sc, d_sc, spl_sc, sp_sc,
                   *, inv_temp, n_valid, tile_r, tile_c, target_labels):
    i = pl.program_id(0)
    j = pl.program_id(1)

    @pl.when(j == 0)
    def _init():
        m_sc[...] = jnp.full_like(m_sc, -1e30)
        d_sc[...] = jnp.zeros_like(d_sc)
        spl_sc[...] = jnp.zeros_like(spl_sc)
        sp_sc[...] = jnp.zeros_like(sp_sc)

    # Similarity scores on the MXU: contract dim 1 of both operands directly
    # (never forming f.T in VMEM); bf16/f32 inputs, f32 accumulation.
    s = lax.dot_general(fr_ref[...], fc_ref[...],
                        dimension_numbers=(((1,), (1,)), ((), ())),
                        preferred_element_type=jnp.float32)
    s = s * inv_temp                                                   # [TR, TC] f32

    # Masks rebuilt in-kernel from labels + GLOBAL indices (no [N,N] inputs).
    row_idx = lax.broadcasted_iota(jnp.int32, (tile_r, tile_c), 0) + i * tile_r
    col_idx = lax.broadcasted_iota(jnp.int32, (tile_r, tile_c), 1) + j * tile_c
    col_valid = col_idx < n_valid
    logits_mask = jnp.logical_and(col_valid, row_idx != col_idx)       # drop self + pad cols

    row_lab = row_lab_ref[...]                                         # [TR, 1] int32
    col_lab = col_lab_ref[...]                                         # [1, TC] int32
    pos = jnp.logical_and(row_lab == col_lab, logits_mask)
    pos_f = pos.astype(jnp.float32)

    # Online log-sum-exp over the contrast axis (max includes the diagonal,
    # matching the PyTorch logits_max; excludes only padded columns).
    s_for_max = jnp.where(col_valid, s, -1e30)
    m_new = jnp.maximum(m_sc[...], jnp.max(s_for_max, axis=1, keepdims=True))
    alpha = jnp.exp(m_sc[...] - m_new)
    e = jnp.where(logits_mask, jnp.exp(s - m_new), 0.0)
    d_sc[...] = alpha * d_sc[...] + jnp.sum(e, axis=1, keepdims=True)
    m_sc[...] = m_new

    # Running positive sums; sum(pos*logits) = sum(pos*s) - m_final*sum(pos),
    # so no rescaling of these accumulators is ever needed.
    spl_sc[...] += jnp.sum(pos_f * s, axis=1, keepdims=True)
    sp_sc[...] += jnp.sum(pos_f, axis=1, keepdims=True)

    @pl.when(j == pl.num_programs(1) - 1)
    def _finalize():
        sp = sp_sc[...]
        # Guarded reciprocal: anchors with zero positives (degenerate / padded
        # rows) contribute 0 instead of NaN.
        # TODO(synk): PyTorch original yields NaN for zero-positive anchors.
        inv_sp = jnp.where(sp > 0.0, 1.0 / jnp.maximum(sp, 1.0), 0.0)
        # mean_log_prob_pos = sum(pos*logits)/sum(pos) - log(denom)
        mean_log_prob_pos = spl_sc[...] * inv_sp - m_sc[...] - jnp.log(d_sc[...])

        # Target-class selector computed in-kernel from labels (static unroll).
        class_mask = jnp.zeros_like(sp)
        for tc in target_labels:
            class_mask = class_mask + (row_lab_ref[...] == tc).astype(jnp.float32)

        row_iota = lax.broadcasted_iota(jnp.int32, (tile_r, 1), 0) + i * tile_r
        valid = jnp.logical_and(row_iota < n_valid, sp > 0.0)
        # -(T/base_T) scale and the /N mean are hoisted to the JAX wrapper.
        out_ref[...] = jnp.where(valid, mean_log_prob_pos * class_mask, 0.0)


def supcon_loss(features, labels, target_labels,
                temperature=0.07, contrast_mode='all', base_temperature=0.07,
                reduction='mean', tile_r=128, tile_c=128,
                matmul_dtype=jnp.bfloat16):
    """Pallas implementation of SupConLoss.forward (contrast_mode='all', reduction='mean')."""
    assert target_labels is not None and len(target_labels) > 0
    assert contrast_mode == 'all'   # TODO(synk): contrast_mode='one' path not implemented
    assert reduction == 'mean'      # TODO(synk): reduction='none' path not implemented
    if features.ndim < 3:
        raise ValueError('`features` needs to be [bsz, n_views, ...]')
    if features.ndim > 3:
        features = features.reshape(features.shape[0], features.shape[1], -1)

    bsz, n_views, dim = features.shape
    n_total = bsz * n_views
    labels = labels.reshape(-1).astype(jnp.int32)
    if labels.shape[0] != bsz:
        raise ValueError('Num of labels does not match num of features')

    # contrast_feature == torch.cat(torch.unbind(features, dim=1), dim=0) -> [N, D], view-major
    contrast_feature = jnp.transpose(features, (1, 0, 2)).reshape(n_total, dim)
    labels_tiled = jnp.tile(labels, n_views)                            # [N]

    # Pad to TPU-friendly shapes (zero features, sentinel -1 labels; masked in-kernel).
    n_pad = _round_up(max(n_total, 1), math.lcm(tile_r, tile_c))
    d_pad = _round_up(dim, 128)

    feat = jnp.zeros((n_pad, d_pad), dtype=matmul_dtype)
    feat = feat.at[:n_total, :dim].set(contrast_feature.astype(matmul_dtype))

    lab_pad = jnp.full((n_pad,), -1, dtype=jnp.int32)
    lab_pad = lab_pad.at[:n_total].set(labels_tiled)
    row_labels = lab_pad.reshape(n_pad, 1)
    col_labels = lab_pad.reshape(1, n_pad)

    grid = (n_pad // tile_r, n_pad // tile_c)

    kernel = functools.partial(
        _supcon_kernel,
        inv_temp=float(1.0 / temperature),
        n_valid=n_total,
        tile_r=tile_r,
        tile_c=tile_c,
        target_labels=tuple(int(t) for t in target_labels),
    )

    per_row = pl.pallas_call(
        kernel,
        out_shape=jax.ShapeDtypeStruct((n_pad, 1), jnp.float32),
        grid_spec=pltpu.PrefetchScalarGridSpec(
            num_scalar_prefetch=0,
            grid=grid,
            in_specs=[
                pl.BlockSpec((tile_r, 1), lambda i, j: (i, 0)),       # row labels
                pl.BlockSpec((1, tile_c), lambda i, j: (0, j)),       # col labels
                pl.BlockSpec((tile_r, d_pad), lambda i, j: (i, 0)),   # anchor feat tile
                pl.BlockSpec((tile_c, d_pad), lambda i, j: (j, 0)),   # contrast feat tile
            ],
            out_specs=pl.BlockSpec((tile_r, 1), lambda i, j: (i, 0)),
            scratch_shapes=[pltpu.VMEM((tile_r, 1), jnp.float32)] * 4,  # m, d, sum(pos*s), sum(pos)
        ),
        compiler_params=pltpu.CompilerParams(
            dimension_semantics=("parallel", "arbitrary"),
            vmem_limit_bytes=32 * 1024 * 1024,
        ),
    )(row_labels, col_labels, feat, feat)

    # reduction='mean' over the [anchor_count, bsz] loss matrix == mean over N.
    return -(temperature / base_temperature) * jnp.sum(per_row) / n_total


def _supcon_loss_ref(features, labels, target_labels,
                     temperature=0.07, base_temperature=0.07,
                     matmul_dtype=jnp.float32):
    """Pure-JAX reference mirroring the PyTorch forward (for correctness check)."""
    bsz, n_views, dim = features.shape
    n_total = bsz * n_views
    cf = jnp.transpose(features, (1, 0, 2)).reshape(n_total, dim)
    cf_m = cf.astype(matmul_dtype)
    adc = jnp.dot(cf_m, cf_m.T, preferred_element_type=jnp.float32) / temperature
    logits = adc - jnp.max(adc, axis=1, keepdims=True)
    mask = (labels[:, None] == labels[None, :]).astype(jnp.float32)
    mask = jnp.tile(mask, (n_views, n_views))
    logits_mask = 1.0 - jnp.eye(n_total, dtype=jnp.float32)
    mask = mask * logits_mask
    exp_logits = jnp.exp(logits) * logits_mask
    log_prob = logits - jnp.log(jnp.sum(exp_logits, axis=1, keepdims=True))
    mean_log_prob_pos = jnp.sum(mask * log_prob, axis=1) / jnp.sum(mask, axis=1)
    loss = -(temperature / base_temperature) * mean_log_prob_pos
    ccm = jnp.zeros((bsz,), jnp.float32)
    for tc in target_labels:
        ccm = ccm + (labels == tc).astype(jnp.float32)
    loss = loss.reshape(n_views, bsz) * ccm[None, :]
    return jnp.mean(loss)


if __name__ == "__main__":
    key = jax.random.PRNGKey(0)
    k_feat, k_lab = jax.random.split(key)

    bsz, n_views, dim = 8, 2, 32
    features = jax.random.normal(k_feat, (bsz, n_views, dim), dtype=jnp.float32)
    # L2-normalize features (typical SupCon usage; module itself does not require it).
    features = features / jnp.linalg.norm(features, axis=-1, keepdims=True)
    labels = jax.random.randint(k_lab, (bsz,), 0, 4, dtype=jnp.int32)
    target_labels = [0, 1]

    # 1) f32-matmul path: exact semantic check against the pure-JAX reference.
    loss_f32 = jax.block_until_ready(
        supcon_loss(features, labels, target_labels, matmul_dtype=jnp.float32))
    ref_f32 = _supcon_loss_ref(features, labels, target_labels, matmul_dtype=jnp.float32)
    assert jnp.allclose(loss_f32, ref_f32, rtol=1e-4, atol=1e-4), (loss_f32, ref_f32)

    # 2) default bf16 MXU path: compare against the matching-precision reference
    #    (tight) and the full-f32 reference (loose, bf16 rounding only).
    loss_bf16 = jax.block_until_ready(supcon_loss(features, labels, target_labels))
    ref_bf16 = _supcon_loss_ref(features, labels, target_labels, matmul_dtype=jnp.bfloat16)
    assert jnp.allclose(loss_bf16, ref_bf16, rtol=1e-4, atol=1e-4), (loss_bf16, ref_bf16)
    assert jnp.allclose(loss_bf16, ref_f32, rtol=5e-2, atol=5e-2), (loss_bf16, ref_f32)

    print("KERNEL_OK")
</pallas_src>

<mosaic_0001>
module attributes {stable_mosaic.version = 11 : i64} {
  func.func @_supcon_kernel(%arg0: i32, %arg1: i32, %arg2: memref<128x1xi32, #tpu.memory_space<vmem>>, %arg3: memref<1x128xi32, #tpu.memory_space<vmem>>, %arg4: memref<128x128xf32, #tpu.memory_space<vmem>>, %arg5: memref<128x128xf32, #tpu.memory_space<vmem>>, %arg6: memref<128x1xf32, #tpu.memory_space<vmem>>, %arg7: memref<128x1xf32, #tpu.memory_space<vmem>>, %arg8: memref<128x1xf32, #tpu.memory_space<vmem>>, %arg9: memref<128x1xf32, #tpu.memory_space<vmem>>, %arg10: memref<128x1xf32, #tpu.memory_space<vmem>>) attributes {dimension_semantics = [#tpu.dimension_semantics<parallel>, #tpu.dimension_semantics<arbitrary>], iteration_bounds = array<i64: 1, 1>, scalar_prefetch = 0 : i64, scratch_operands = 4 : i64, tpu.core_type = #tpu.core_type<tc>, window_params = [{transform_indices = @transform_0, window_bounds = array<i64: 128, 1>}, {transform_indices = @transform_1, window_bounds = array<i64: 1, 128>}, {transform_indices = @transform_2, window_bounds = array<i64: 128, 128>}, {transform_indices = @transform_3, window_bounds = array<i64: 128, 128>}, {transform_indices = @transform_4, window_bounds = array<i64: 128, 1>}]} {
    %c0_i32 = arith.constant 0 : i32
    %0 = arith.cmpi eq, %arg1, %c0_i32 : i32
    %1 = arith.extui %0 : i1 to i32
    %c0_i32_0 = arith.constant 0 : i32
    %2 = arith.cmpi ne, %1, %c0_i32_0 : i32
    scf.if %2 {
      %cst_36 = arith.constant -1.000000e+30 : f32
      %63 = vector.broadcast %cst_36 : f32 to vector<128x1xf32>
      %c0_37 = arith.constant 0 : index
      %c0_38 = arith.constant 0 : index
      %64 = vector.load %arg7[%c0_37, %c0_38] : memref<128x1xf32, #tpu.memory_space<vmem>>, vector<128x1xf32>
      tpu.vector_store %arg7[%c0_37, %c0_38], %63 {strides = array<i32>} : memref<128x1xf32, #tpu.memory_space<vmem>>, vector<128x1xf32>,
      %cst_39 = arith.constant 0.000000e+00 : f32
      %65 = vector.broadcast %cst_39 : f32 to vector<128x1xf32>
      %c0_40 = arith.constant 0 : index
      %c0_41 = arith.constant 0 : index
      %66 = vector.load %arg8[%c0_40, %c0_41] : memref<128x1xf32, #tpu.memory_space<vmem>>, vector<128x1xf32>
      tpu.vector_store %arg8[%c0_40, %c0_41], %65 {strides = array<i32>} : memref<128x1xf32, #tpu.memory_space<vmem>>, vector<128x1xf32>,
      %cst_42 = arith.constant 0.000000e+00 : f32
      %67 = vector.broadcast %cst_42 : f32 to vector<128x1xf32>
      %c0_43 = arith.constant 0 : index
      %c0_44 = arith.constant 0 : index
      %68 = vector.load %arg9[%c0_43, %c0_44] : memref<128x1xf32, #tpu.memory_space<vmem>>, vector<128x1xf32>
      tpu.vector_store %arg9[%c0_43, %c0_44], %67 {strides = array<i32>} : memref<128x1xf32, #tpu.memory_space<vmem>>, vector<128x1xf32>,
      %cst_45 = arith.constant 0.000000e+00 : f32
      %69 = vector.broadcast %cst_45 : f32 to vector<128x1xf32>
      %c0_46 = arith.constant 0 : index
      %c0_47 = arith.constant 0 : index
      %70 = vector.load %arg10[%c0_46, %c0_47] : memref<128x1xf32, #tpu.memory_space<vmem>>, vector<128x1xf32>
      tpu.vector_store %arg10[%c0_46, %c0_47], %69 {strides = array<i32>} : memref<128x1xf32, #tpu.memory_space<vmem>>, vector<128x1xf32>,
    } else {
    }
    %c0 = arith.constant 0 : index
    %c0_1 = arith.constant 0 : index
    %3 = vector.load %arg4[%c0, %c0_1] : memref<128x128xf32, #tpu.memory_space<vmem>>, vector<128x128xf32>
    %c0_2 = arith.constant 0 : index
    %c0_3 = arith.constant 0 : index
    %4 = vector.load %arg5[%c0_2, %c0_3] : memref<128x128xf32, #tpu.memory_space<vmem>>, vector<128x128xf32>
    %cst = arith.constant dense<0.000000e+00> : vector<128x128xf32>
    %5 = tpu.matmul %3, %4, %cst {dimension_numbers = #tpu.dot_dimension_numbers<[1], [1], [0], [0], [0, 0, 1, 0], [], []>} : vector<128x128xf32>, vector<128x128xf32>, vector<128x128xf32> -> vector<128x128xf32>
    %cst_4 = arith.constant 14.2857141 : f32
    %6 = vector.broadcast %cst_4 : f32 to vector<128x128xf32>
    %7 = arith.mulf %5, %6 : vector<128x128xf32>
    %8 = tpu.iota {dimensions = array<i32: 0>} : vector<128x128xi32>
    %c128_i32 = arith.constant 128 : i32
    %9 = arith.muli %arg0, %c128_i32 : i32
    %10 = vector.broadcast %9 : i32 to vector<128x128xi32>
    %11 = arith.addi %8, %10 : vector<128x128xi32>
    %12 = tpu.iota {dimensions = array<i32: 1>} : vector<128x128xi32>
    %c128_i32_5 = arith.constant 128 : i32
    %13 = arith.muli %arg1, %c128_i32_5 : i32
    %14 = vector.broadcast %13 : i32 to vector<128x128xi32>
    %15 = arith.addi %12, %14 : vector<128x128xi32>
    %c16_i32 = arith.constant 16 : i32
    %16 = vector.broadcast %c16_i32 : i32 to vector<128x128xi32>
    %17 = arith.cmpi slt, %15, %16 : vector<128x128xi32>
    %18 = arith.cmpi ne, %11, %15 : vector<128x128xi32>
    %19 = arith.andi %17, %18 : vector<128x128xi1>
    %c0_6 = arith.constant 0 : index
    %c0_7 = arith.constant 0 : index
    %20 = vector.load %arg2[%c0_6, %c0_7] : memref<128x1xi32, #tpu.memory_space<vmem>>, vector<128x1xi32>
    %c0_8 = arith.constant 0 : index
    %c0_9 = arith.constant 0 : index
    %21 = vector.load %arg3[%c0_8, %c0_9] : memref<1x128xi32, #tpu.memory_space<vmem>>, vector<1x128xi32>
    %22 = vector.broadcast %20 : vector<128x1xi32> to vector<128x128xi32>
    %23 = vector.broadcast %21 : vector<1x128xi32> to vector<128x128xi32>
    %24 = arith.cmpi eq, %22, %23 : vector<128x128xi32>
    %25 = arith.andi %24, %19 : vector<128x128xi1>
    %26 = arith.extui %25 : vector<128x128xi1> to vector<128x128xi32>
    %27 = arith.sitofp %26 : vector<128x128xi32> to vector<128x128xf32>
    %cst_10 = arith.constant -1.000000e+30 : f32
    %28 = vector.broadcast %cst_10 : f32 to vector<128x128xf32>
    %29 = arith.select %17, %7, %28 : vector<128x128xi1>, vector<128x128xf32>
    %c0_11 = arith.constant 0 : index
    %c0_12 = arith.constant 0 : index
    %30 = vector.load %arg7[%c0_11, %c0_12] : memref<128x1xf32, #tpu.memory_space<vmem>>, vector<128x1xf32>
    %cst_13 = arith.constant dense<0xFF800000> : vector<128xf32>
    %31 = vector.multi_reduction <maximumf>, %29, %cst_13 [1] : vector<128x128xf32> to vector<128xf32>
    %32 = vector.shape_cast %31 : vector<128xf32> to vector<128x1xf32>
    %33 = arith.maximumf %30, %32 : vector<128x1xf32>
    %c0_14 = arith.constant 0 : index
    %c0_15 = arith.constant 0 : index
    %34 = vector.load %arg7[%c0_14, %c0_15] : memref<128x1xf32, #tpu.memory_space<vmem>>, vector<128x1xf32>
    %35 = arith.subf %34, %33 : vector<128x1xf32>
    %36 = math.exp %35 : vector<128x1xf32>
    %37 = vector.broadcast %33 : vector<128x1xf32> to vector<128x128xf32>
    %38 = arith.subf %7, %37 : vector<128x128xf32>
    %39 = math.exp %38 : vector<128x128xf32>
    %cst_16 = arith.constant 0.000000e+00 : f32
    %40 = vector.broadcast %cst_16 : f32 to vector<128x128xf32>
    %41 = arith.select %19, %39, %40 : vector<128x128xi1>, vector<128x128xf32>
    %c0_17 = arith.constant 0 : index
    %c0_18 = arith.constant 0 : index
    %42 = vector.load %arg8[%c0_17, %c0_18] : memref<128x1xf32, #tpu.memory_space<vmem>>, vector<128x1xf32>
    %43 = arith.mulf %36, %42 : vector<128x1xf32>
    %cst_19 = arith.constant dense<0.000000e+00> : vector<128xf32>
    %44 = vector.multi_reduction <add>, %41, %cst_19 [1] : vector<128x128xf32> to vector<128xf32>
    %45 = vector.shape_cast %44 : vector<128xf32> to vector<128x1xf32>
    %46 = arith.addf %43, %45 : vector<128x1xf32>
    %c0_20 = arith.constant 0 : index
    %c0_21 = arith.constant 0 : index
    %47 = vector.load %arg8[%c0_20, %c0_21] : memref<128x1xf32, #tpu.memory_space<vmem>>, vector<128x1xf32>
    tpu.vector_store %arg8[%c0_20, %c0_21], %46 {strides = array<i32>} : memref<128x1xf32, #tpu.memory_space<vmem>>, vector<128x1xf32>,
    %c0_22 = arith.constant 0 : index
    %c0_23 = arith.constant 0 : index
    %48 = vector.load %arg7[%c0_22, %c0_23] : memref<128x1xf32, #tpu.memory_space<vmem>>, vector<128x1xf32>
    tpu.vector_store %arg7[%c0_22, %c0_23], %33 {strides = array<i32>} : memref<128x1xf32, #tpu.memory_space<vmem>>, vector<128x1xf32>,
    %c0_24 = arith.constant 0 : index
    %c0_25 = arith.constant 0 : index
    %49 = vector.load %arg9[%c0_24, %c0_25] : memref<128x1xf32, #tpu.memory_space<vmem>>, vector<128x1xf32>
    %50 = arith.mulf %27, %7 : vector<128x128xf32>
    %cst_26 = arith.constant dense<0.000000e+00> : vector<128xf32>
    %51 = vector.multi_reduction <add>, %50, %cst_26 [1] : vector<128x128xf32> to vector<128xf32>
    %52 = vector.shape_cast %51 : vector<128xf32> to vector<128x1xf32>
    %53 = arith.addf %49, %52 : vector<128x1xf32>
    %c0_27 = arith.constant 0 : index
    %c0_28 = arith.constant 0 : index
    %54 = vector.load %arg9[%c0_27, %c0_28] : memref<128x1xf32, #tpu.memory_space<vmem>>, vector<128x1xf32>
    tpu.vector_store %arg9[%c0_27, %c0_28], %53 {strides = array<i32>} : memref<128x1xf32, #tpu.memory_space<vmem>>, vector<128x1xf32>,
    %c0_29 = arith.constant 0 : index
    %c0_30 = arith.constant 0 : index
    %55 = vector.load %arg10[%c0_29, %c0_30] : memref<128x1xf32, #tpu.memory_space<vmem>>, vector<128x1xf32>
    %cst_31 = arith.constant dense<0.000000e+00> : vector<128xf32>
    %56 = vector.multi_reduction <add>, %27, %cst_31 [1] : vector<128x128xf32> to vector<128xf32>
    %57 = vector.shape_cast %56 : vector<128xf32> to vector<128x1xf32>
    %58 = arith.addf %55, %57 : vector<128x1xf32>
    %c0_32 = arith.constant 0 : index
    %c0_33 = arith.constant 0 : index
    %59 = vector.load %arg10[%c0_32, %c0_33] : memref<128x1xf32, #tpu.memory_space<vmem>>, vector<128x1xf32>
    tpu.vector_store %arg10[%c0_32, %c0_33], %58 {strides = array<i32>} : memref<128x1xf32, #tpu.memory_space<vmem>>, vector<128x1xf32>,
    %c0_i32_34 = arith.constant 0 : i32
    %60 = arith.cmpi eq, %arg1, %c0_i32_34 : i32
    %61 = arith.extui %60 : i1 to i32
    %c0_i32_35 = arith.constant 0 : i32
    %62 = arith.cmpi ne, %61, %c0_i32_35 : i32
    scf.if %62 {
      %c0_36 = arith.constant 0 : index
      %c0_37 = arith.constant 0 : index
      %63 = vector.load %arg10[%c0_36, %c0_37] : memref<128x1xf32, #tpu.memory_space<vmem>>, vector<128x1xf32>
      %cst_38 = arith.constant 0.000000e+00 : f32
      %64 = vector.broadcast %cst_38 : f32 to vector<128x1xf32>
      %65 = arith.cmpf ogt, %63, %64 : vector<128x1xf32>
      %cst_39 = arith.constant 1.000000e+00 : f32
      %66 = vector.broadcast %cst_39 : f32 to vector<128x1xf32>
      %67 = arith.maximumf %63, %66 : vector<128x1xf32>
      %cst_40 = arith.constant 1.000000e+00 : f32
      %68 = vector.broadcast %cst_40 : f32 to vector<128x1xf32>
      %69 = arith.divf %68, %67 : vector<128x1xf32>
      %cst_41 = arith.constant 0.000000e+00 : f32
      %70 = vector.broadcast %cst_41 : f32 to vector<128x1xf32>
      %71 = arith.select %65, %69, %70 : vector<128x1xi1>, vector<128x1xf32>
      %c0_42 = arith.constant 0 : index
      %c0_43 = arith.constant 0 : index
      %72 = vector.load %arg9[%c0_42, %c0_43] : memref<128x1xf32, #tpu.memory_space<vmem>>, vector<128x1xf32>
      %73 = arith.mulf %72, %71 : vector<128x1xf32>
      %c0_44 = arith.constant 0 : index
      %c0_45 = arith.constant 0 : index
      %74 = vector.load %arg7[%c0_44, %c0_45] : memref<128x1xf32, #tpu.memory_space<vmem>>, vector<128x1xf32>
      %75 = arith.subf %73, %74 : vector<128x1xf32>
      %c0_46 = arith.constant 0 : index
      %c0_47 = arith.constant 0 : index
      %76 = vector.load %arg8[%c0_46, %c0_47] : memref<128x1xf32, #tpu.memory_space<vmem>>, vector<128x1xf32>
      %77 = math.log %76 : vector<128x1xf32>
      %78 = arith.subf %75, %77 : vector<128x1xf32>
      %cst_48 = arith.constant 0.000000e+00 : f32
      %79 = vector.broadcast %cst_48 : f32 to vector<128x1xf32>
      %c0_49 = arith.constant 0 : index
      %c0_50 = arith.constant 0 : index
      %80 = vector.load %arg2[%c0_49, %c0_50] : memref<128x1xi32, #tpu.memory_space<vmem>>, vector<128x1xi32>
      %c0_i32_51 = arith.constant 0 : i32
      %81 = vector.broadcast %c0_i32_51 : i32 to vector<128x1xi32>
      %82 = arith.cmpi eq, %80, %81 : vector<128x1xi32>
      %83 = arith.extui %82 : vector<128x1xi1> to vector<128x1xi32>
      %84 = arith.sitofp %83 : vector<128x1xi32> to vector<128x1xf32>
      %85 = arith.addf %79, %84 : vector<128x1xf32>
      %c0_52 = arith.constant 0 : index
      %c0_53 = arith.constant 0 : index
      %86 = vector.load %arg2[%c0_52, %c0_53] : memref<128x1xi32, #tpu.memory_space<vmem>>, vector<128x1xi32>
      %c1_i32 = arith.constant 1 : i32
      %87 = vector.broadcast %c1_i32 : i32 to vector<128x1xi32>
      %88 = arith.cmpi eq, %86, %87 : vector<128x1xi32>
      %89 = arith.extui %88 : vector<128x1xi1> to vector<128x1xi32>
      %90 = arith.sitofp %89 : vector<128x1xi32> to vector<128x1xf32>
      %91 = arith.addf %85, %90 : vector<128x1xf32>
      %92 = tpu.iota {dimensions = array<i32: 0>} : vector<128x1xi32>
      %c128_i32_54 = arith.constant 128 : i32
      %93 = arith.muli %arg0, %c128_i32_54 : i32
      %94 = vector.broadcast %93 : i32 to vector<128x1xi32>
      %95 = arith.addi %92, %94 : vector<128x1xi32>
      %c16_i32_55 = arith.constant 16 : i32
      %96 = vector.broadcast %c16_i32_55 : i32 to vector<128x1xi32>
      %97 = arith.cmpi slt, %95, %96 : vector<128x1xi32>
      %cst_56 = arith.constant 0.000000e+00 : f32
      %98 = vector.broadcast %cst_56 : f32 to vector<128x1xf32>
      %99 = arith.cmpf ogt, %63, %98 : vector<128x1xf32>
      %100 = arith.andi %97, %99 : vector<128x1xi1>
      %101 = arith.mulf %78, %91 : vector<128x1xf32>
      %cst_57 = arith.constant 0.000000e+00 : f32
      %102 = vector.broadcast %cst_57 : f32 to vector<128x1xf32>
      %103 = arith.select %100, %101, %102 : vector<128x1xi1>, vector<128x1xf32>
      %c0_58 = arith.constant 0 : index
      %c0_59 = arith.constant 0 : index
      %104 = vector.load %arg6[%c0_58, %c0_59] : memref<128x1xf32, #tpu.memory_space<vmem>>, vector<128x1xf32>
      tpu.vector_store %arg6[%c0_58, %c0_59], %103 {strides = array<i32>} : memref<128x1xf32, #tpu.memory_space<vmem>>, vector<128x1xf32>,
    } else {
    }
    return
  }
  func.func @transform_0(%arg0: i32, %arg1: i32) -> (i32, i32) {
    %c0_i32 = arith.constant 0 : i32
    %c0_i32_0 = arith.constant 0 : i32
    return %arg0, %c0_i32 : i32, i32
  }
  func.func @transform_1(%arg0: i32, %arg1: i32) -> (i32, i32) {
    %c0_i32 = arith.constant 0 : i32
    %c0_i32_0 = arith.constant 0 : i32
    return %c0_i32, %arg1 : i32, i32
  }
  func.func @transform_2(%arg0: i32, %arg1: i32) -> (i32, i32) {
    %c0_i32 = arith.constant 0 : i32
    %c0_i32_0 = arith.constant 0 : i32
    return %arg0, %c0_i32 : i32, i32
  }
  func.func @transform_3(%arg0: i32, %arg1: i32) -> (i32, i32) {
    %c0_i32 = arith.constant 0 : i32
    %c0_i32_0 = arith.constant 0 : i32
    return %arg1, %c0_i32 : i32, i32
  }
  func.func @transform_4(%arg0: i32, %arg1: i32) -> (i32, i32) {
    %c0_i32 = arith.constant 0 : i32
    %c0_i32_0 = arith.constant 0 : i32
    return %arg0, %c0_i32 : i32, i32
  }
}

</mosaic_0001>

<bundles_post_ra>
// kernel: tpu_custom_call.1
= control target key start
LH: loop header
LB: loop body
LE: loop exit
PB: predicated region body
PF: predicated region fallthrough
CT: control target
= control target key end

     0   :  { %9 = vsyncpa [#allocation7], 0  ;;  %s1805_s15 = smov [#allocation6]   ;;  %s2886_s0 = inlined_call_operand.vmem [shape: s32[128,1], index: 0, kind: input, shape index: {}]   ;;  %s2887_s1 = inlined_call_operand.vmem [shape: s32[1,128], index: 1, kind: input, shape index: {}]   ;;  %s2888_s2 = inlined_call_operand.vmem [shape: f32[128,128], index: 2, kind: input, shape index: {}]   ;;  %s2889_s3 = inlined_call_operand.hbm [shape: f32[128,128], index: 3, kind: input, shape index: {}]   ;;  %s2890_s4 = inlined_call_operand.vmem [shape: f32[128,1], index: 4, kind: output, shape index: {}]  }
   0x1   :  { %s21_s16 = sshll.u32 %s1805_s15, 4  ;;  %s1781_s19 = scalar_lea.hbm %s2889_s3, 2048  ;;  %s22_s16 = int_to_ptr.vmem [resolvable:$true] %s21_s16 }
   0x2   :  { %p1782_p0 = scmp.ne.s32.totalorder %s2889_s3, %s1781_s19  ;;  %p1785_p1 = scmp.lt.u32.totalorder %s1781_s19, %s2889_s3 }
   0x4   :  { %p1787_p2 = pnand %p1785_p1, %p1782_p0 }
   0x6   :  { %1790 = shalt.err (!%p1787_p2)
}
   0x7   :  { %s1791_s24 = scalar_lea.vmem %s22_s16, 2048  ;;  %p1796_p4 = scmp.lt.s32.totalorder %s22_s16, %s22_s16 }
   0x8   :  { %p1792_p3 = scmp.ne.s32.totalorder %s22_s16, %s1791_s24  ;;  %p1797_p5 = scmp.lt.s32.totalorder %s1791_s24, %s1791_s24 }
   0xa   :  { %p1798_p6 = por %p1797_p5, %p1796_p4 }
   0xc   :  { %p1799_p7 = pnand %p1798_p6, %p1792_p3 }
   0xe   :  { %1802 = shalt.err (!%p1799_p7)
}
   0xf   :  { %s1806_s25 = smov 128   ;;  %s1807_s26 = smov 8  }
  0x10   :  { %27 = dma.hbm_to_vmem [thread:$0]  %s2889_s3, 2048, %s22_s16, [#allocation7], %s1806_s25, %s1806_s25, %s1807_s26  }
  0x11   :  { %1803 = dma.done.wait [#allocation7], 2048  }
  0x12   :  { %1804 = vsyncadd [#allocation7], 4294965248  ;;  %vm2891_vm0 = vcmask 7168   ;;  %v2892_v0 = vmov 0.0   ;;  %v1809_v1 = vmov 0   ;;  %v116_v2 = vld [vmem:[#allocation6] sm:$0xff]  ;;  %v293_v58 = vlaneseq }
  0x13   :  { %1497 = vst.msk [vmem:[%s2890_s4 + $0x10] sm:$0xff] %vm2891_vm0, %v2892_v0  ;;  %1498 = vst.msk [vmem:[%s2890_s4 + $0x18] sm:$0xff] %vm2891_vm0, %v2892_v0  ;;  %1707 = vset.pattern.permute.xlu0 %v1809_v1  ;;  %1708 = vset.pattern.permute.xlu1 %v1809_v1  ;;  %v117_v3 = vld [vmem:[#allocation6 + $0x8] sm:$0xff]  ;;  %v118_v4 = vld [vmem:[#allocation6 + $0x10] sm:$0xff] }
  0x14   :  { %1499 = vst.msk [vmem:[%s2890_s4 + $0x20] sm:$0xff] %vm2891_vm0, %v2892_v0  ;;  %1500 = vst.msk [vmem:[%s2890_s4 + $0x28] sm:$0xff] %vm2891_vm0, %v2892_v0  ;;  %v1653_v5 = vpack.c.bf16 %v117_v3, %v116_v2  ;;  %v119_v6 = vld [vmem:[#allocation6 + $0x18] sm:$0xff]  ;;  %v100_v8 = vld [vmem:[%s2888_s2] sm:$0xff]  ;;  %v2110_v59 = vshrl.u32 %v293_v58, 7  ;;  %v2112_v60 = vand.u32 127, %v293_v58 }
  0x15   :  { %1501 = vst.msk [vmem:[%s2890_s4 + $0x30] sm:$0xff] %vm2891_vm0, %v2892_v0  ;;  %1502 = vst.msk [vmem:[%s2890_s4 + $0x38] sm:$0xff] %vm2891_vm0, %v2892_v0  ;;  %v1657_v7 = vpack.c.bf16 %v119_v6, %v118_v4  ;;  %v108_v9 = vld [vmem:[%s2888_s2 + $0x40] sm:$0xff]  ;;  %v121_v11 = vld [vmem:[#allocation6 + $0x28] sm:$0xff]  ;;  %1629 = vmatprep.mubr.f32.mxu0 %v100_v8  ;;  %v2931_v58 = vmov 0 }
  0x16   :  { %1503 = vst.msk [vmem:[%s2890_s4 + $0x40] sm:$0xff] %vm2891_vm0, %v2892_v0  ;;  %1504 = vst.msk [vmem:[%s2890_s4 + $0x48] sm:$0xff] %vm2891_vm0, %v2892_v0  ;;  %1654 = vmatprep.subr.bf16.mxu0 %v1653_v5  ;;  %1685 = vmatprep.subr.bf16.mxu1 %v1653_v5  ;;  %v120_v10 = vld [vmem:[#allocation6 + $0x20] sm:$0xff]  ;;  %v367_v14 = vld [vmem:[%s2886_s0 + $0x8] sm:$0xff]  ;;  %vm333_vm1 = vcmp.lt.s32.totalorder %v2112_v60, 16  ;;  %vm334_vm2 = vcmp.ne.s32.totalorder %v2110_v59, %v2112_v60  ;;  %v295_v61 = vadd.s32 8, %v2110_v59 }
  0x17   :  { %1505 = vst.msk [vmem:[%s2890_s4 + $0x50] sm:$0xff] %vm2891_vm0, %v2892_v0  ;;  %1506 = vst.msk [vmem:[%s2890_s4 + $0x58] sm:$0xff] %vm2891_vm0, %v2892_v0  ;;  %1656 = vmatpush3.bf16.xpose.msra.mxu0 %v1653_v5  ;;  %1693 = vmatpush3.bf16.xpose.msra.mxu1 %v1653_v5  ;;  %v1661_v12 = vpack.c.bf16 %v121_v11, %v120_v10  ;;  %v366_v13 = vld [vmem:[%s2886_s0] sm:$0xff]  ;;  %v368_v15 = vld [vmem:[%s2886_s0 + $0x10] sm:$0xff] }
  0x18   :  { %1507 = vst.msk [vmem:[%s2890_s4 + $0x60] sm:$0xff] %vm2891_vm0, %v2892_v0  ;;  %1508 = vst.msk [vmem:[%s2890_s4 + $0x68] sm:$0xff] %vm2891_vm0, %v2892_v0  ;;  %1658 = vmatprep.subr.bf16.mxu0 %v1657_v7  ;;  %1686 = vmatprep.subr.bf16.mxu1 %v1657_v7  ;;  %v122_v16 = vld [vmem:[#allocation6 + $0x30] sm:$0xff]  ;;  %v123_v17 = vld [vmem:[#allocation6 + $0x38] sm:$0xff]  ;;  %vm335_vm4 = vcmp.ne.s32.totalorder %v295_v61, %v2112_v60 }
  0x19   :  { %1509 = vst.msk [vmem:[%s2890_s4 + $0x70] sm:$0xff] %vm2891_vm0, %v2892_v0  ;;  %1510 = vst.msk [vmem:[%s2890_s4 + $0x78] sm:$0xff] %vm2891_vm0, %v2892_v0  ;;  %1641 = vmatprep.mubr.f32.mxu1 %v108_v9  ;;  %384 = vperm.xlu0 %1707, %v366_v13   ;;  %v369_v18 = vld [vmem:[%s2886_s0 + $0x18] sm:$0xff]  ;;  %v370_v19 = vld [vmem:[%s2886_s0 + $0x20] sm:$0xff]  ;;  %v1665_v20 = vpack.c.bf16 %v123_v17, %v122_v16 }
  0x1a   :  { %52 = vst.msk [vmem:[#allocation3] sm:$0xff] %vm2891_vm0, %v2892_v0  ;;  %53 = vst.msk [vmem:[#allocation3 + $0x8] sm:$0xff] %vm2891_vm0, %v2892_v0  ;;  %390 = vperm.xlu1 %1708, %v368_v15   ;;  %v371_v21 = vld [vmem:[%s2886_s0 + $0x28] sm:$0xff]  ;;  %v372_v22 = vld [vmem:[%s2886_s0 + $0x30] sm:$0xff] }
  0x1b   :  { %54 = vst.msk [vmem:[#allocation3 + $0x10] sm:$0xff] %vm2891_vm0, %v2892_v0  ;;  %55 = vst.msk [vmem:[#allocation3 + $0x18] sm:$0xff] %vm2891_vm0, %v2892_v0  ;;  %v124_v23 = vld [vmem:[#allocation6 + $0x40] sm:$0xff]  ;;  %v125_v24 = vld [vmem:[#allocation6 + $0x48] sm:$0xff] }
  0x1c   :  { %56 = vst.msk [vmem:[#allocation3 + $0x20] sm:$0xff] %vm2891_vm0, %v2892_v0  ;;  %57 = vst.msk [vmem:[#allocation3 + $0x28] sm:$0xff] %vm2891_vm0, %v2892_v0  ;;  %v373_v25 = vld [vmem:[%s2886_s0 + $0x38] sm:$0xff]  ;;  %v374_v26 = vld [vmem:[%s2886_s0 + $0x40] sm:$0xff]  ;;  %v1669_v27 = vpack.c.bf16 %v125_v24, %v124_v23 }
  0x1d   :  { %58 = vst.msk [vmem:[#allocation3 + $0x30] sm:$0xff] %vm2891_vm0, %v2892_v0  ;;  %59 = vst.msk [vmem:[#allocation3 + $0x38] sm:$0xff] %vm2891_vm0, %v2892_v0  ;;  %387 = vperm.xlu0 %1707, %v367_v14   ;;  %v375_v28 = vld [vmem:[%s2886_s0 + $0x48] sm:$0xff]  ;;  %v376_v29 = vld [vmem:[%s2886_s0 + $0x50] sm:$0xff] }
  0x1e   :  { %60 = vst.msk [vmem:[#allocation3 + $0x40] sm:$0xff] %vm2891_vm0, %v2892_v0  ;;  %61 = vst.msk [vmem:[#allocation3 + $0x48] sm:$0xff] %vm2891_vm0, %v2892_v0  ;;  %393 = vperm.xlu1 %1708, %v369_v18   ;;  %v126_v30 = vld [vmem:[#allocation6 + $0x50] sm:$0xff]  ;;  %v127_v31 = vld [vmem:[#allocation6 + $0x58] sm:$0xff]  ;;  %v1810_v18 = vmov -1e+30  }
  0x1f   :  { %62 = vst.msk [vmem:[#allocation3 + $0x50] sm:$0xff] %vm2891_vm0, %v2892_v0  ;;  %63 = vst.msk [vmem:[#allocation3 + $0x58] sm:$0xff] %vm2891_vm0, %v2892_v0  ;;  %1660 = vmatpush3.bf16.xpose.msra.mxu0 %v1657_v7  ;;  %1694 = vmatpush3.bf16.xpose.msra.mxu1 %v1657_v7  ;;  %v377_v32 = vld [vmem:[%s2886_s0 + $0x58] sm:$0xff]  ;;  %v378_v33 = vld [vmem:[%s2886_s0 + $0x60] sm:$0xff]  ;;  %v1673_v34 = vpack.c.bf16 %v127_v31, %v126_v30 }
  0x20   :  { %64 = vst.msk [vmem:[#allocation3 + $0x60] sm:$0xff] %vm2891_vm0, %v2892_v0  ;;  %65 = vst.msk [vmem:[#allocation3 + $0x68] sm:$0xff] %vm2891_vm0, %v2892_v0  ;;  %1662 = vmatprep.subr.bf16.mxu0 %v1661_v12  ;;  %1687 = vmatprep.subr.bf16.mxu1 %v1661_v12  ;;  %v379_v35 = vld [vmem:[%s2886_s0 + $0x68] sm:$0xff]  ;;  %v380_v36 = vld [vmem:[%s2886_s0 + $0x70] sm:$0xff] }
  0x21   :  { %66 = vst.msk [vmem:[#allocation3 + $0x70] sm:$0xff] %vm2891_vm0, %v2892_v0  ;;  %67 = vst.msk [vmem:[#allocation3 + $0x78] sm:$0xff] %vm2891_vm0, %v2892_v0  ;;  %396 = vperm.xlu0 %1707, %v370_v19   ;;  %v128_v37 = vld [vmem:[#allocation6 + $0x60] sm:$0xff]  ;;  %v129_v38 = vld [vmem:[#allocation6 + $0x68] sm:$0xff]  ;;  %v296_v19 = vadd.s32 16, %v2110_v59 }
  0x22   :  { %68 = vst.msk [vmem:[#allocation4] sm:$0xff] %vm2891_vm0, %v2892_v0  ;;  %69 = vst.msk [vmem:[#allocation4 + $0x8] sm:$0xff] %vm2891_vm0, %v2892_v0  ;;  %399 = vperm.xlu1 %1708, %v371_v21   ;;  %v381_v39 = vld [vmem:[%s2886_s0 + $0x78] sm:$0xff]  ;;  %v1677_v40 = vpack.c.bf16 %v129_v38, %v128_v37  ;;  %v130_v41 = vld [vmem:[#allocation6 + $0x70] sm:$0xff] }
  0x23   :  { %70 = vst.msk [vmem:[#allocation4 + $0x10] sm:$0xff] %vm2891_vm0, %v2892_v0  ;;  %71 = vst.msk [vmem:[#allocation4 + $0x18] sm:$0xff] %vm2891_vm0, %v2892_v0  ;;  %v131_v42 = vld [vmem:[#allocation6 + $0x78] sm:$0xff]  ;;  %v101_v44 = vld [vmem:[%s2888_s2 + $0x8] sm:$0xff]  ;;  %vm336_vm14 = vcmp.ne.s32.totalorder %v296_v19, %v2112_v60  ;;  %v304_v19 = vadd.s32 80, %v2110_v59 }
  0x24   :  { %72 = vst.msk [vmem:[#allocation4 + $0x20] sm:$0xff] %vm2891_vm0, %v2892_v0  ;;  %73 = vst.msk [vmem:[#allocation4 + $0x28] sm:$0xff] %vm2891_vm0, %v2892_v0  ;;  %v1681_v43 = vpack.c.bf16 %v131_v42, %v130_v41  ;;  %v109_v45 = vld [vmem:[%s2888_s2 + $0x48] sm:$0xff]  ;;  %v102_v46 = vld [vmem:[%s2888_s2 + $0x10] sm:$0xff] }
  0x25   :  { %74 = vst.msk [vmem:[#allocation4 + $0x30] sm:$0xff] %vm2891_vm0, %v2892_v0  ;;  %75 = vst.msk [vmem:[#allocation4 + $0x38] sm:$0xff] %vm2891_vm0, %v2892_v0  ;;  %402 = vperm.xlu0 %1707, %v372_v22   ;;  %v110_v47 = vld [vmem:[%s2888_s2 + $0x50] sm:$0xff]  ;;  %v103_v48 = vld [vmem:[%s2888_s2 + $0x18] sm:$0xff] }
  0x26   :  { %76 = vst.msk [vmem:[#allocation4 + $0x40] sm:$0xff] %vm2891_vm0, %v2892_v0  ;;  %77 = vst.msk [vmem:[#allocation4 + $0x48] sm:$0xff] %vm2891_vm0, %v2892_v0  ;;  %405 = vperm.xlu1 %1708, %v373_v25   ;;  %v111_v49 = vld [vmem:[%s2888_s2 + $0x58] sm:$0xff]  ;;  %v104_v50 = vld [vmem:[%s2888_s2 + $0x20] sm:$0xff] }
  0x27   :  { %78 = vst.msk [vmem:[#allocation4 + $0x50] sm:$0xff] %vm2891_vm0, %v2892_v0  ;;  %79 = vst.msk [vmem:[#allocation4 + $0x58] sm:$0xff] %vm2891_vm0, %v2892_v0  ;;  %1664 = vmatpush3.bf16.xpose.msra.mxu0 %v1661_v12  ;;  %1695 = vmatpush3.bf16.xpose.msra.mxu1 %v1661_v12  ;;  %v112_v51 = vld [vmem:[%s2888_s2 + $0x60] sm:$0xff]  ;;  %v105_v52 = vld [vmem:[%s2888_s2 + $0x28] sm:$0xff] }
  0x28   :  { %80 = vst.msk [vmem:[#allocation4 + $0x60] sm:$0xff] %vm2891_vm0, %v2892_v0  ;;  %81 = vst.msk [vmem:[#allocation4 + $0x68] sm:$0xff] %vm2891_vm0, %v2892_v0  ;;  %1666 = vmatprep.subr.bf16.mxu0 %v1665_v20  ;;  %1688 = vmatprep.subr.bf16.mxu1 %v1665_v20  ;;  %v113_v53 = vld [vmem:[%s2888_s2 + $0x68] sm:$0xff]  ;;  %v106_v54 = vld [vmem:[%s2888_s2 + $0x30] sm:$0xff] }
  0x29   :  { %82 = vst.msk [vmem:[#allocation4 + $0x70] sm:$0xff] %vm2891_vm0, %v2892_v0  ;;  %83 = vst.msk [vmem:[#allocation4 + $0x78] sm:$0xff] %vm2891_vm0, %v2892_v0  ;;  %408 = vperm.xlu0 %1707, %v374_v26   ;;  %v114_v55 = vld [vmem:[%s2888_s2 + $0x70] sm:$0xff]  ;;  %v107_v56 = vld [vmem:[%s2888_s2 + $0x38] sm:$0xff] }
  0x2a   :  { %84 = vst.msk [vmem:[#allocation5] sm:$0xff] %vm2891_vm0, %v2892_v0  ;;  %85 = vst.msk [vmem:[#allocation5 + $0x8] sm:$0xff] %vm2891_vm0, %v2892_v0  ;;  %411 = vperm.xlu1 %1708, %v375_v28   ;;  %v115_v57 = vld [vmem:[%s2888_s2 + $0x78] sm:$0xff]  ;;  %v2121_v62 = vld [vmem:[%s2887_s1] ss:$0 sm:$0xff] }
  0x2b   :  { %86 = vst.msk [vmem:[#allocation5 + $0x10] sm:$0xff] %vm2891_vm0, %v2892_v0  ;;  %87 = vst.msk [vmem:[#allocation5 + $0x18] sm:$0xff] %vm2891_vm0, %v2892_v0 }
  0x2c   :  { %88 = vst.msk [vmem:[#allocation5 + $0x20] sm:$0xff] %vm2891_vm0, %v2892_v0  ;;  %89 = vst.msk [vmem:[#allocation5 + $0x28] sm:$0xff] %vm2891_vm0, %v2892_v0 }
  0x2d   :  { %90 = vst.msk [vmem:[#allocation5 + $0x30] sm:$0xff] %vm2891_vm0, %v2892_v0  ;;  %91 = vst.msk [vmem:[#allocation5 + $0x38] sm:$0xff] %vm2891_vm0, %v2892_v0  ;;  %414 = vperm.xlu0 %1707, %v376_v29  }
  0x2e   :  { %92 = vst.msk [vmem:[#allocation5 + $0x40] sm:$0xff] %vm2891_vm0, %v2892_v0  ;;  %93 = vst.msk [vmem:[#allocation5 + $0x48] sm:$0xff] %vm2891_vm0, %v2892_v0  ;;  %417 = vperm.xlu1 %1708, %v377_v32  }
  0x2f   :  { %94 = vst.msk [vmem:[#allocation5 + $0x50] sm:$0xff] %vm2891_vm0, %v2892_v0  ;;  %95 = vst.msk [vmem:[#allocation5 + $0x58] sm:$0xff] %vm2891_vm0, %v2892_v0  ;;  %1668 = vmatpush3.bf16.xpose.msra.mxu0 %v1665_v20  ;;  %1696 = vmatpush3.bf16.xpose.msra.mxu1 %v1665_v20  ;;  %v302_v20 = vadd.s32 64, %v2110_v59 }
  0x30   :  { %96 = vst.msk [vmem:[#allocation5 + $0x60] sm:$0xff] %vm2891_vm0, %v2892_v0  ;;  %97 = vst.msk [vmem:[#allocation5 + $0x68] sm:$0xff] %vm2891_vm0, %v2892_v0  ;;  %1670 = vmatprep.subr.bf16.mxu0 %v1669_v27  ;;  %1689 = vmatprep.subr.bf16.mxu1 %v1669_v27 }
  0x31   :  { %98 = vst.msk [vmem:[#allocation5 + $0x70] sm:$0xff] %vm2891_vm0, %v2892_v0  ;;  %99 = vst.msk [vmem:[#allocation5 + $0x78] sm:$0xff] %vm2891_vm0, %v2892_v0  ;;  %420 = vperm.xlu0 %1707, %v378_v33   ;;  %vm342_vm15 = vcmp.ne.s32.totalorder %v302_v20, %v2112_v60 }
  0x32   :  { %423 = vperm.xlu1 %1708, %v379_v35   ;;  %vm2125_vm3 = vmand %vm333_vm1, %vm334_vm2  ;;  %37 = vst.msk [vmem:[#allocation2 + $0x8] sm:$0xff] %vm2891_vm0, %v1810_v18  ;;  %v980_v35 = vld [vmem:[#allocation5] sm:$0xff] }
  0x33   :  { %vm2138_vm7 = vmand %vm333_vm1, %vm335_vm4  ;;  %36 = vst.msk [vmem:[#allocation2] sm:$0xff] %vm2891_vm0, %v1810_v18 }
  0x34   :  { %38 = vst.msk [vmem:[#allocation2 + $0x10] sm:$0xff] %vm2891_vm0, %v1810_v18  ;;  %39 = vst.msk [vmem:[#allocation2 + $0x18] sm:$0xff] %vm2891_vm0, %v1810_v18 }
  0x35   :  { %426 = vperm.xlu0 %1707, %v380_v36   ;;  %40 = vst.msk [vmem:[#allocation2 + $0x20] sm:$0xff] %vm2891_vm0, %v1810_v18  ;;  %41 = vst.msk [vmem:[#allocation2 + $0x28] sm:$0xff] %vm2891_vm0, %v1810_v18  ;;  %v298_v36 = vadd.s32 32, %v2110_v59 }
  0x36   :  { %429 = vperm.xlu1 %1708, %v381_v39   ;;  %42 = vst.msk [vmem:[#allocation2 + $0x30] sm:$0xff] %vm2891_vm0, %v1810_v18  ;;  %43 = vst.msk [vmem:[#allocation2 + $0x38] sm:$0xff] %vm2891_vm0, %v1810_v18 }
  0x37   :  { %1672 = vmatpush3.bf16.xpose.msra.mxu0 %v1669_v27  ;;  %1697 = vmatpush3.bf16.xpose.msra.mxu1 %v1669_v27  ;;  %44 = vst.msk [vmem:[#allocation2 + $0x40] sm:$0xff] %vm2891_vm0, %v1810_v18  ;;  %45 = vst.msk [vmem:[#allocation2 + $0x48] sm:$0xff] %vm2891_vm0, %v1810_v18 }
  0x38   :  { %1674 = vmatprep.subr.bf16.mxu0 %v1673_v34  ;;  %1690 = vmatprep.subr.bf16.mxu1 %v1673_v34  ;;  %46 = vst.msk [vmem:[#allocation2 + $0x50] sm:$0xff] %vm2891_vm0, %v1810_v18  ;;  %47 = vst.msk [vmem:[#allocation2 + $0x58] sm:$0xff] %vm2891_vm0, %v1810_v18 }
  0x39   :  { %48 = vst.msk [vmem:[#allocation2 + $0x60] sm:$0xff] %vm2891_vm0, %v1810_v18  ;;  %49 = vst.msk [vmem:[#allocation2 + $0x68] sm:$0xff] %vm2891_vm0, %v1810_v18 }
  0x3a   :  { %50 = vst.msk [vmem:[#allocation2 + $0x70] sm:$0xff] %vm2891_vm0, %v1810_v18  ;;  %51 = vst.msk [vmem:[#allocation2 + $0x78] sm:$0xff] %vm2891_vm0, %v1810_v18 }
  0x3b   :  { %vm2210_vm2 = vmand %vm333_vm1, %vm336_vm14  ;;  %vm338_vm14 = vcmp.ne.s32.totalorder %v298_v36, %v2112_v60 }
  0x3f   :  { %1676 = vmatpush3.bf16.xpose.msra.mxu0 %v1673_v34  ;;  %1698 = vmatpush3.bf16.xpose.msra.mxu1 %v1673_v34 }
  0x40   :  { %1678 = vmatprep.subr.bf16.mxu0 %v1677_v40  ;;  %1691 = vmatprep.subr.bf16.mxu1 %v1677_v40 }
  0x47   :  { %1680 = vmatpush3.bf16.xpose.msra.mxu0 %v1677_v40  ;;  %1699 = vmatpush3.bf16.xpose.msra.mxu1 %v1677_v40 }
  0x48   :  { %1682 = vmatprep.subr.bf16.mxu0 %v1681_v43  ;;  %1692 = vmatprep.subr.bf16.mxu1 %v1681_v43 }
  0x4f   :  { %1684 = vmatpush3.bf16.xpose.msra.mxu0 %v1681_v43  ;;  %1700 = vmatpush3.bf16.xpose.msra.mxu1 %v1681_v43 }
  0x56   :  { %1630 = vmatmul.mubr.f32.vlgmr.msra.gmra.mrb[0].mxu0 %v101_v44  ;;  %1642 = vmatmul.mubr.f32.vlgmr.msra.gmra.mrb[0].mxu1 %v109_v45 }
  0x57   :  { %1632 = vmatprep.mubr.f32.mxu0 %v102_v46  ;;  %1644 = vmatprep.mubr.f32.mxu1 %v110_v47 }
  0x5a   :  { %1633 = vmatmul.mubr.f32.gmra.mrb[2].mxu0 %v103_v48  ;;  %1645 = vmatmul.mubr.f32.gmra.mrb[2].mxu1 %v111_v49  ;;  %v981_v48 = vld [vmem:[#allocation5 + $0x8] sm:$0xff] }
  0x5b   :  { %1635 = vmatprep.mubr.f32.mxu0 %v104_v50  ;;  %1647 = vmatprep.mubr.f32.mxu1 %v112_v51 }
  0x5e   :  { %1636 = vmatmul.mubr.f32.gmra.mrb[4].mxu0 %v105_v52  ;;  %1648 = vmatmul.mubr.f32.gmra.mrb[4].mxu1 %v113_v53 }
  0x5f   :  { %1638 = vmatprep.mubr.f32.mxu0 %v106_v54  ;;  %1650 = vmatprep.mubr.f32.mxu1 %v114_v55 }
  0x62   :  { %1639 = vmatmul.mubr.f32.gmra.mrb[6].mxu0 %v107_v56  ;;  %1651 = vmatmul.mubr.f32.gmra.mrb[6].mxu1 %v115_v57 }
  0x98   :  { %v385_v1 = vpop.permute.xlu0 %384 }
  0x99   :  { %vm435_vm5 = vcmp.eq.s32.totalorder %v385_v1, %v2121_v62  ;;  %v2142_v4 = vpop.permute.xlu1 %390 }
  0x9a   :  { %vm451_vm6 = vmand %vm435_vm5, %vm2125_vm3  ;;  %vm437_vm4 = vcmp.eq.s32.totalorder %v2142_v4, %v2121_v62 }
  0x9b   :  { %v2134_v2 = vsel %vm451_vm6, 1.0, %v2892_v0  ;;  %vm2221_vm5 = vmand %vm333_vm1, %vm342_vm15 }
  0x9c   :  { %v388_v5 = vpop.permute.xlu0 %387  ;;  %996 = vadd.xlane.f32.xlu0 %v2134_v2  ;;  %vm2274_vm15 = vmand %vm333_vm1, %vm338_vm14 }
  0x9d   :  { %vm436_vm8 = vcmp.eq.s32.totalorder %v388_v5, %v2121_v62  ;;  %v2151_v7 = vpop.permute.xlu1 %393  ;;  %v2932_v58 = vsel %vm2274_vm15, 4294967295, %v2931_v58 }
  0x9e   :  { %vm452_vm9 = vmand %vm436_vm8, %vm2138_vm7  ;;  %vm438_vm12 = vcmp.eq.s32.totalorder %v2151_v7, %v2121_v62 }
  0x9f   :  { %v2149_v6 = vsel %vm452_vm9, 1.0, %v2892_v0  ;;  %vm2237_vm8 = vmand %vm437_vm4, %vm2210_vm2 }
  0xa0   :  { %v2153_v8 = vpop.permute.xlu0 %396  ;;  %998 = vadd.xlane.f32.xlu1 %v2149_v6  ;;  %v2265_v53 = vsel %vm2237_vm8, 1.0, %v2892_v0  ;;  %vm344_vm8 = vcmp.ne.s32.totalorder %v304_v19, %v2112_v60 }
  0xa1   :  { %v2156_v9 = vpop.permute.xlu1 %399  ;;  %vm439_vm4 = vcmp.eq.s32.totalorder %v2153_v8, %v2121_v62 }
  0xa4   :  { %v2158_v10 = vpop.permute.xlu0 %402 }
  0xa5   :  { %v2160_v11 = vpop.permute.xlu1 %405 }
  0xa8   :  { %v409_v12 = vpop.permute.xlu0 %408 }
  0xa9   :  { %v2162_v13 = vpop.permute.xlu1 %411  ;;  %vm443_vm6 = vcmp.eq.s32.totalorder %v409_v12, %v2121_v62 }
  0xaa   :  { %vm444_vm10 = vcmp.eq.s32.totalorder %v2162_v13, %v2121_v62  ;;  %vm459_vm9 = vmand %vm443_vm6, %vm2221_vm5 }
  0xab   :  { %v2260_v52 = vsel %vm459_vm9, 1.0, %v2892_v0  ;;  %vm455_vm6 = vmand %vm439_vm4, %vm2274_vm15 }
  0xac   :  { %v2164_v14 = vpop.permute.xlu0 %414  ;;  %vm2321_vm4 = vmand %vm333_vm1, %vm344_vm8 }
  0xad   :  { %v2172_v16 = vpop.permute.xlu1 %417 }
  0xb0   :  { %v2168_v15 = vpop.permute.xlu0 %420 }
  0xb1   :  { %v2176_v17 = vpop.permute.xlu1 %423 }
  0xb4   :  { %v2204_v27 = vpop.permute.xlu0 %426 }
  0xb5   :  { %v2241_v41 = vpop.permute.xlu1 %429 }
 0x129   :  { %v1631_v21 = vpop.f32.mrb[0].mxu0  ;;  %v1643_v22 = vpop.f32.mrb[0].mxu1 }
 0x12a   :  { %v2200_v23 = vmul.f32 14.285714, %v1631_v21  ;;  %v2202_v24 = vmul.f32 14.285714, %v1643_v22  ;;  %v198_v25 = vpop.f32.mrb[1].mxu0  ;;  %v238_v26 = vpop.f32.mrb[1].mxu1 }
 0x12b   :  { %v2206_v28 = vmul.f32 14.285714, %v198_v25  ;;  %v997_v42 = vpop.xlane.xlu0 %996  ;;  %v2245_v43 = vmul.f32 14.285714, %v238_v26  ;;  %v297_v22 = vadd.s32 24, %v2110_v59  ;;  %v300_v26 = vadd.s32 48, %v2110_v59 }
 0x12c   :  { %v500_v30 = vsel %vm333_vm1, %v2200_v23, -1e+30  ;;  %v508_v39 = vsel %vm333_vm1, %v2202_v24, -1e+30  ;;  %v1028_v45 = vadd.f32 %v997_v42, %v980_v35  ;;  %v901_v18 = vmul.f32 %v2149_v6, %v2200_v23 }
 0x12d   :  { %v1646_v32 = vpop.f32.mrb[2].mxu1  ;;  %533 = vmax.xlane.f32.xlu1 %v500_v30  ;;  %v499_v33 = vsel %vm333_vm1, %v2206_v28, -1e+30  ;;  %v1634_v34 = vpop.f32.mrb[2].mxu0  ;;  %v900_v44 = vmul.f32 %v2134_v2, %v2206_v28  ;;  %v507_v55 = vsel %vm333_vm1, %v2245_v43, -1e+30  ;;  %v908_v56 = vmul.f32 %v2260_v52, %v2245_v43 }
 0x12e   :  { %v2230_v37 = vpop.f32.mrb[3].mxu1  ;;  %531 = vmax.xlane.f32.xlu0 %v499_v33  ;;  %v208_v38 = vpop.f32.mrb[3].mxu0  ;;  %1044 = vst.msk [vmem:[#allocation5] sm:$0xff] %vm2891_vm0, %v1028_v45  ;;  %v2280_v2 = vmul.f32 14.285714, %v1634_v34  ;;  %v2303_v6 = vsel %vm455_vm6, 1.0, %v2892_v0  ;;  %vm337_vm9 = vcmp.ne.s32.totalorder %v297_v22, %v2112_v60  ;;  %vm340_vm14 = vcmp.ne.s32.totalorder %v300_v26, %v2112_v60 }
 0x12f   :  { %v2254_v49 = vmul.f32 14.285714, %v208_v38  ;;  %v999_v54 = vpop.xlane.xlu1 %998  ;;  %v2294_v20 = vmul.f32 14.285714, %v1646_v32  ;;  %vm445_vm6 = vcmp.eq.s32.totalorder %v2164_v14, %v2121_v62  ;;  %vm2329_vm13 = vmand %vm333_vm1, %vm337_vm9  ;;  %v2937_v38 = vmov 0 }
 0x130   :  { %v1029_v57 = vadd.f32 %v999_v54, %v981_v48  ;;  %v502_v21 = vsel %vm333_vm1, %v2280_v2, -1e+30  ;;  %vm2337_vm8 = vmand %vm333_vm1, %vm340_vm14  ;;  %vm441_vm14 = vcmp.eq.s32.totalorder %v2158_v10, %v2121_v62  ;;  %v2943_v26 = vmov 0 }
 0x131   :  { %v2249_v46 = vpop.f32.mrb[4].mxu1  ;;  %549 = vmax.xlane.f32.xlu1 %v508_v39  ;;  %v2251_v47 = vpop.f32.mrb[4].mxu0  ;;  %v902_v12 = vmul.f32 %v2265_v53, %v2254_v49  ;;  %v510_v32 = vsel %vm333_vm1, %v2294_v20, -1e+30  ;;  %v2938_v38 = vsel %vm2337_vm8, 4294967295, %v2937_v38  ;;  %vm461_vm9 = vmand %vm445_vm6, %vm2321_vm4 }
 0x132   :  { %v2256_v50 = vpop.f32.mrb[5].mxu1  ;;  %916 = vadd.xlane.f32.xlu0 %v900_v44  ;;  %v218_v51 = vpop.f32.mrb[5].mxu0  ;;  %1045 = vst.msk [vmem:[#allocation5 + $0x8] sm:$0xff] %vm2891_vm0, %v1029_v57  ;;  %v2347_v39 = vmul.f32 14.285714, %v2230_v37  ;;  %vm454_vm11 = vmand %vm438_vm12, %vm2329_vm13  ;;  %v2357_v40 = vsel %vm461_vm9, 1.0, %v2892_v0  ;;  %vm440_vm9 = vcmp.eq.s32.totalorder %v2156_v9, %v2121_v62  ;;  %vm442_vm0 = vcmp.eq.s32.totalorder %v2160_v11, %v2121_v62 }
 0x133   :  { %v2291_v8 = vmul.f32 14.285714, %v218_v51  ;;  %v501_v7 = vsel %vm333_vm1, %v2254_v49, -1e+30  ;;  %vm457_vm6 = vmand %vm441_vm14, %vm2337_vm8  ;;  %v2369_v44 = vsel %vm454_vm11, 1.0, %v2892_v0  ;;  %v301_v9 = vadd.s32 56, %v2110_v59 }
 0x134   :  { %v509_v42 = vsel %vm333_vm1, %v2347_v39, -1e+30  ;;  %v910_v10 = vmul.f32 %v2357_v40, %v2347_v39  ;;  %v903_v45 = vmul.f32 %v2369_v44, %v2280_v2  ;;  %v2374_v48 = vsel %vm457_vm6, 1.0, %v2892_v0 }
 0x135   :  { %v1652_v61 = vpop.f32.mrb[6].mxu1  ;;  %547 = vmax.xlane.f32.xlu1 %v507_v55  ;;  %v1640_v1 = vpop.f32.mrb[6].mxu0  ;;  %v904_v30 = vmul.f32 %v2303_v6, %v2291_v8  ;;  %v2377_v51 = vmul.f32 14.285714, %v2251_v47  ;;  %v2386_v57 = vmul.f32 14.285714, %v2249_v46 }
 0x136   :  { %v2282_v4 = vpop.f32.mrb[7].mxu1  ;;  %932 = vadd.xlane.f32.xlu0 %v908_v56  ;;  %v228_v5 = vpop.f32.mrb[7].mxu0  ;;  %v2300_v25 = vmul.f32 14.285714, %v1640_v1  ;;  %v2313_v33 = vmul.f32 14.285714, %v1652_v61 }
 0x137   :  { %v2361_v37 = vmul.f32 14.285714, %v228_v5  ;;  %v504_v55 = vsel %vm333_vm1, %v2377_v51, -1e+30  ;;  %v299_v56 = vadd.s32 40, %v2110_v59  ;;  %v2939_v61 = vmov 0 }
 0x138   :  { %v506_v34 = vsel %vm333_vm1, %v2300_v25, -1e+30  ;;  %v514_v14 = vsel %vm333_vm1, %v2313_v33, -1e+30  ;;  %v512_v47 = vsel %vm333_vm1, %v2386_v57, -1e+30 }
 0x139   :  { %918 = vadd.xlane.f32.xlu1 %v901_v18  ;;  %v906_v54 = vmul.f32 %v2374_v48, %v2361_v37  ;;  %vm339_vm11 = vcmp.ne.s32.totalorder %v299_v56, %v2112_v60  ;;  %v503_v46 = vsel %vm333_vm1, %v2291_v8, -1e+30  ;;  %v2406_v1 = vmul.f32 14.285714, %v2256_v50  ;;  %v884_v56 = vld [vmem:[#allocation4] sm:$0xff] }
 0x13a   :  { %920 = vadd.xlane.f32.xlu0 %v902_v12  ;;  %vm2394_vm12 = vmand %vm333_vm1, %vm339_vm11  ;;  %v303_v5 = vadd.s32 72, %v2110_v59  ;;  %v2430_v22 = vmul.f32 14.285714, %v2282_v4 }
 0x13b   :  { %v2940_v61 = vsel %vm2394_vm12, 4294967295, %v2939_v61  ;;  %vm456_vm14 = vmand %vm440_vm9, %vm2394_vm12  ;;  %v511_v12 = vsel %vm333_vm1, %v2406_v1, -1e+30  ;;  %vm341_vm9 = vcmp.ne.s32.totalorder %v301_v9, %v2112_v60 }
 0x13c   :  { %v2413_v18 = vsel %vm456_vm14, 1.0, %v2892_v0  ;;  %vm343_vm6 = vcmp.ne.s32.totalorder %v303_v5, %v2112_v60  ;;  %v513_v4 = vsel %vm333_vm1, %v2430_v22, -1e+30 }
 0x13d   :  { %537 = vmax.xlane.f32.xlu1 %v502_v21  ;;  %v905_v19 = vmul.f32 %v2413_v18, %v2377_v51  ;;  %vm2421_vm11 = vmand %vm333_vm1, %vm343_vm6  ;;  %v505_v21 = vsel %vm333_vm1, %v2361_v37, -1e+30 }
 0x13e   :  { %924 = vadd.xlane.f32.xlu0 %v904_v30  ;;  %vm460_vm14 = vmand %vm444_vm10, %vm2421_vm11 }
 0x13f   :  { %vm2439_vm6 = vmand %vm333_vm1, %vm341_vm9  ;;  %v2449_v30 = vsel %vm460_vm14, 1.0, %v2892_v0 }
 0x140   :  { %v2944_v26 = vsel %vm2439_vm6, 4294967295, %v2943_v26  ;;  %vm458_vm10 = vmand %vm442_vm0, %vm2439_vm6  ;;  %v909_v13 = vmul.f32 %v2449_v30, %v2202_v24  ;;  %vm2945_vm0 = vcmask 7168  }
 0x141   :  { %553 = vmax.xlane.f32.xlu1 %v510_v32  ;;  %v2456_v32 = vsel %vm458_vm10, 1.0, %v2892_v0  ;;  %vm2946_vm9 = vmmov %vm2945_vm0 }
 0x142   :  { %545 = vmax.xlane.f32.xlu0 %v506_v34  ;;  %v907_v11 = vmul.f32 %v2456_v32, %v2300_v25  ;;  %v2460_v34 = vld [vmem:[#allocation2 + $0x8] sm:$0xff]  ;;  %vm2949_vm14 = vmmov %vm2945_vm0 }
 0x143   :  { %vm2950_vm10 = vmmov %vm2945_vm0 }
 0x145   :  { %535 = vmax.xlane.f32.xlu1 %v501_v7 }
 0x146   :  { %561 = vmax.xlane.f32.xlu0 %v514_v14  ;;  %v2462_v14 = vld [vmem:[#allocation2] sm:$0xff] }
 0x149   :  { %551 = vmax.xlane.f32.xlu1 %v509_v42 }
 0x14a   :  { %936 = vadd.xlane.f32.xlu0 %v910_v10 }
 0x14d   :  { %922 = vadd.xlane.f32.xlu1 %v903_v45 }
 0x14e   :  { %928 = vadd.xlane.f32.xlu0 %v906_v54  ;;  %v2470_v54 = vld [vmem:[#allocation2 + $0x48] sm:$0xff] }
 0x151   :  { %541 = vmax.xlane.f32.xlu1 %v504_v55 }
 0x155   :  { %557 = vmax.xlane.f32.xlu1 %v512_v47 }
 0x159   :  { %539 = vmax.xlane.f32.xlu1 %v503_v46 }
 0x15d   :  { %555 = vmax.xlane.f32.xlu1 %v511_v12 }
 0x161   :  { %926 = vadd.xlane.f32.xlu1 %v905_v19  ;;  %v2485_v19 = vld [vmem:[#allocation2 + $0x40] sm:$0xff] }
 0x162   :  { %2948 = vst [vmem:[#allocation10_spill] sm:$0xff] %v2485_v19 }
 0x165   :  { %543 = vmax.xlane.f32.xlu1 %v505_v21 }
 0x169   :  { %559 = vmax.xlane.f32.xlu1 %v513_v4  ;;  %v892_v4 = vld [vmem:[#allocation4 + $0x40] sm:$0xff] }
 0x16d   :  { %934 = vadd.xlane.f32.xlu1 %v909_v13 }
 0x171   :  { %930 = vadd.xlane.f32.xlu1 %v907_v11 }
 0x1ba   :  { %v534_v7 = vpop.xlane.xlu1 %533 }
 0x1bb   :  { %v2465_v42 = vmax.f32 %v2460_v34, %v534_v7  ;;  %v532_v10 = vpop.xlane.xlu0 %531 }
 0x1bc   :  { %v2468_v45 = vmax.f32 %v2462_v14, %v532_v10 }
 0x1bd   :  { %869 = vst.msk [vmem:[#allocation2 + $0x8] sm:$0xff] %vm2945_vm0, %v2465_v42  ;;  %634 = vperm.xlu0 %1707, %v2465_v42  }
 0x1be   :  { %868 = vst.msk [vmem:[#allocation2] sm:$0xff] %vm2946_vm9, %v2468_v45  ;;  %v550_v46 = vpop.xlane.xlu1 %549  ;;  %629 = vperm.xlu1 %1708, %v2468_v45   ;;  %vm2952_vm9 = vmmov %vm2945_vm0 }
 0x1bf   :  { %v2483_v5 = vmax.f32 %v2470_v54, %v550_v46  ;;  %v917_v12 = vpop.xlane.xlu0 %916 }
 0x1c0   :  { %v948_v9 = vadd.f32 %v917_v12, %v884_v56  ;;  %v885_v56 = vld [vmem:[#allocation4 + $0x8] sm:$0xff]  ;;  %v886_v12 = vld [vmem:[#allocation4 + $0x10] sm:$0xff] }
 0x1c1   :  { %2947 = vst [vmem:[#allocation9_spill] sm:$0xff] %v2483_v5  ;;  %877 = vst.msk [vmem:[#allocation2 + $0x48] sm:$0xff] %vm2949_vm14, %v2483_v5  ;;  %674 = vperm.xlu0 %1707, %v2483_v5  }
 0x1c2   :  { %964 = vst.msk [vmem:[#allocation4] sm:$0xff] %vm2950_vm10, %v948_v9  ;;  %v548_v13 = vpop.xlane.xlu1 %547  ;;  %vm2954_vm14 = vmmov %vm2945_vm0 }
 0x1c3   :  { %v2494_v11 = vmax.f32 %v2485_v19, %v548_v13  ;;  %v933_v7 = vpop.xlane.xlu0 %932  ;;  %v2502_v13 = vld [vmem:[#allocation2 + $0x18] sm:$0xff]  ;;  %vm2955_vm10 = vmmov %vm2945_vm0 }
 0x1c4   :  { %v956_v10 = vadd.f32 %v933_v7, %v892_v4  ;;  %2953 = vst [vmem:[#allocation12_spill] sm:$0xff] %v2502_v13  ;;  %v888_v4 = vld [vmem:[#allocation4 + $0x20] sm:$0xff]  ;;  %v2509_v19 = vld [vmem:[#allocation2 + $0x58] sm:$0xff] }
 0x1c5   :  { %2951 = vst [vmem:[#allocation11_spill] sm:$0xff] %v2494_v11  ;;  %876 = vst.msk [vmem:[#allocation2 + $0x40] sm:$0xff] %vm2945_vm0, %v2494_v11  ;;  %669 = vperm.xlu1 %1708, %v2494_v11  }
 0x1c6   :  { %972 = vst.msk [vmem:[#allocation4 + $0x40] sm:$0xff] %vm2952_vm9, %v956_v10  ;;  %v919_v21 = vpop.xlane.xlu1 %918  ;;  %2957 = vst [vmem:[#allocation14_spill] sm:$0xff] %v2509_v19 }
 0x1c7   :  { %v949_v9 = vadd.f32 %v919_v21, %v885_v56  ;;  %v921_v47 = vpop.xlane.xlu0 %920  ;;  %vm2959_vm9 = vmmov %vm2945_vm0  ;;  %v2544_v21 = vld [vmem:[#allocation2 + $0x50] sm:$0xff] }
 0x1c8   :  { %v950_v55 = vadd.f32 %v921_v47, %v886_v12  ;;  %v2516_v47 = vld [vmem:[#allocation2 + $0x38] sm:$0xff]  ;;  %v2525_v12 = vld [vmem:[#allocation2 + $0x10] sm:$0xff] }
 0x1c9   :  { %965 = vst.msk [vmem:[#allocation4 + $0x8] sm:$0xff] %vm2954_vm14, %v949_v9  ;;  %2958 = vst [vmem:[#allocation15_spill] sm:$0xff] %v2516_v47 }
 0x1ca   :  { %966 = vst.msk [vmem:[#allocation4 + $0x10] sm:$0xff] %vm2955_vm10, %v950_v55  ;;  %v538_v7 = vpop.xlane.xlu1 %537  ;;  %2962 = vst [vmem:[#allocation18_spill] sm:$0xff] %v2525_v12 }
 0x1cb   :  { %v2507_v46 = vmax.f32 %v2502_v13, %v538_v7  ;;  %v925_v0 = vpop.xlane.xlu0 %924  ;;  %vm2963_vm14 = vmmov %vm2945_vm0  ;;  %v887_v13 = vld [vmem:[#allocation4 + $0x18] sm:$0xff] }
 0x1cc   :  { %v952_v11 = vadd.f32 %v925_v0, %v888_v4  ;;  %v2532_v4 = vld [vmem:[#allocation2 + $0x78] sm:$0xff]  ;;  %vm2965_vm10 = vmmov %vm2945_vm0 }
 0x1cd   :  { %2956 = vst [vmem:[#allocation13_spill] sm:$0xff] %v2507_v46  ;;  %871 = vst.msk [vmem:[#allocation2 + $0x18] sm:$0xff] %vm2945_vm0, %v2507_v46  ;;  %644 = vperm.xlu1 %1708, %v2507_v46  }
 0x1ce   :  { %968 = vst.msk [vmem:[#allocation4 + $0x20] sm:$0xff] %vm2959_vm9, %v952_v11  ;;  %v554_v55 = vpop.xlane.xlu1 %553  ;;  %2964 = vst [vmem:[#allocation19_spill] sm:$0xff] %v2532_v4  ;;  %v894_v11 = vld [vmem:[#allocation4 + $0x50] sm:$0xff] }
 0x1cf   :  { %v2520_v10 = vmax.f32 %v2509_v19, %v554_v55  ;;  %v546_v56 = vpop.xlane.xlu0 %545  ;;  %vm2968_vm9 = vmmov %vm2945_vm0 }
 0x1d0   :  { %v2523_v0 = vmax.f32 %v2516_v47, %v546_v56 }
 0x1d1   :  { %2960 = vst [vmem:[#allocation16_spill] sm:$0xff] %v2520_v10  ;;  %879 = vst.msk [vmem:[#allocation2 + $0x58] sm:$0xff] %vm2963_vm14, %v2520_v10  ;;  %684 = vperm.xlu0 %1707, %v2520_v10   ;;  %v2571_v10 = vld [vmem:[#allocation2 + $0x68] sm:$0xff] }
 0x1d2   :  { %2961 = vst [vmem:[#allocation17_spill] sm:$0xff] %v2523_v0  ;;  %875 = vst.msk [vmem:[#allocation2 + $0x38] sm:$0xff] %vm2965_vm10, %v2523_v0  ;;  %v536_v7 = vpop.xlane.xlu1 %535 }
 0x1d3   :  { %v2539_v55 = vmax.f32 %v2525_v12, %v536_v7  ;;  %v562_v56 = vpop.xlane.xlu0 %561  ;;  %vm2970_vm14 = vmmov %vm2945_vm0 }
 0x1d4   :  { %v2542_v9 = vmax.f32 %v2532_v4, %v562_v56  ;;  %vm2971_vm10 = vmmov %vm2945_vm0 }
 0x1d5   :  { %2966 = vst [vmem:[#allocation20_spill] sm:$0xff] %v2539_v55  ;;  %870 = vst.msk [vmem:[#allocation2 + $0x10] sm:$0xff] %vm2945_vm0, %v2539_v55  ;;  %639 = vperm.xlu1 %1708, %v2539_v55   ;;  %v890_v55 = vld [vmem:[#allocation4 + $0x30] sm:$0xff] }
 0x1d6   :  { %2967 = vst [vmem:[#allocation21_spill] sm:$0xff] %v2542_v9  ;;  %883 = vst.msk [vmem:[#allocation2 + $0x78] sm:$0xff] %vm2968_vm9, %v2542_v9  ;;  %v552_v7 = vpop.xlane.xlu1 %551 }
 0x1d7   :  { %v2556_v56 = vmax.f32 %v2544_v21, %v552_v7  ;;  %v937_v19 = vpop.xlane.xlu0 %936  ;;  %v2564_v7 = vld [vmem:[#allocation2 + $0x28] sm:$0xff]  ;;  %vm2972_vm9 = vmmov %vm2945_vm0 }
 0x1d8   :  { %v958_v46 = vadd.f32 %v937_v19, %v894_v11 }
 0x1d9   :  { %2969 = vst [vmem:[#allocation22_spill] sm:$0xff] %v2556_v56  ;;  %878 = vst.msk [vmem:[#allocation2 + $0x50] sm:$0xff] %vm2970_vm14, %v2556_v56  ;;  %679 = vperm.xlu1 %1708, %v2556_v56   ;;  %v889_v56 = vld [vmem:[#allocation4 + $0x28] sm:$0xff] }
 0x1da   :  { %974 = vst.msk [vmem:[#allocation4 + $0x50] sm:$0xff] %vm2971_vm10, %v958_v46  ;;  %v923_v47 = vpop.xlane.xlu1 %922  ;;  %vm2973_vm14 = vmmov %vm2945_vm0 }
 0x1db   :  { %v951_v4 = vadd.f32 %v923_v47, %v887_v13  ;;  %v929_v12 = vpop.xlane.xlu0 %928  ;;  %v2581_v47 = vld [vmem:[#allocation2 + $0x20] sm:$0xff]  ;;  %vm2976_vm10 = vmmov %vm2945_vm0 }
 0x1dc   :  { %v954_v5 = vadd.f32 %v929_v12, %v890_v55  ;;  %2975 = vst [vmem:[#allocation24_spill] sm:$0xff] %v2581_v47  ;;  %v2591_v55 = vld [vmem:[#allocation2 + $0x60] sm:$0xff] }
 0x1dd   :  { %967 = vst.msk [vmem:[#allocation4 + $0x18] sm:$0xff] %vm2945_vm0, %v951_v4  ;;  %2978 = vst [vmem:[#allocation26_spill] sm:$0xff] %v2591_v55 }
 0x1de   :  { %970 = vst.msk [vmem:[#allocation4 + $0x30] sm:$0xff] %vm2972_vm9, %v954_v5  ;;  %v542_v19 = vpop.xlane.xlu1 %541  ;;  %vm2980_vm9 = vmmov %vm2945_vm0 }
 0x1df   :  { %v2569_v11 = vmax.f32 %v2564_v7, %v542_v19 }
 0x1e1   :  { %873 = vst.msk [vmem:[#allocation2 + $0x28] sm:$0xff] %vm2973_vm14, %v2569_v11  ;;  %654 = vperm.xlu0 %1707, %v2569_v11   ;;  %vm2982_vm14 = vmmov %vm2945_vm0 }
 0x1e2   :  { %v558_v46 = vpop.xlane.xlu1 %557 }
 0x1e3   :  { %v2579_v13 = vmax.f32 %v2571_v10, %v558_v46 }
 0x1e5   :  { %2974 = vst [vmem:[#allocation23_spill] sm:$0xff] %v2579_v13  ;;  %881 = vst.msk [vmem:[#allocation2 + $0x68] sm:$0xff] %vm2976_vm10, %v2579_v13  ;;  %694 = vperm.xlu0 %1707, %v2579_v13   ;;  %v2614_v13 = vld [vmem:[#allocation2 + $0x70] sm:$0xff] }
 0x1e6   :  { %v540_v12 = vpop.xlane.xlu1 %539  ;;  %vm2984_vm10 = vmmov %vm2945_vm0 }
 0x1e7   :  { %v2589_v4 = vmax.f32 %v2581_v47, %v540_v12 }
 0x1e9   :  { %2977 = vst [vmem:[#allocation25_spill] sm:$0xff] %v2589_v4  ;;  %872 = vst.msk [vmem:[#allocation2 + $0x20] sm:$0xff] %vm2945_vm0, %v2589_v4  ;;  %664 = vperm.xlu0 %1707, %v2523_v0   ;;  %649 = vperm.xlu1 %1708, %v2589_v4   ;;  %v2608_v0 = vld [vmem:[#allocation2 + $0x30] sm:$0xff] }
 0x1ea   :  { %v556_v46 = vpop.xlane.xlu1 %555  ;;  %2981 = vst [vmem:[#allocation28_spill] sm:$0xff] %v2608_v0 }
 0x1eb   :  { %v2600_v5 = vmax.f32 %v2591_v55, %v556_v46  ;;  %v891_v55 = vld [vmem:[#allocation4 + $0x38] sm:$0xff] }
 0x1ed   :  { %2979 = vst [vmem:[#allocation27_spill] sm:$0xff] %v2600_v5  ;;  %880 = vst.msk [vmem:[#allocation2 + $0x60] sm:$0xff] %vm2980_vm9, %v2600_v5  ;;  %704 = vperm.xlu0 %1707, %v2542_v9   ;;  %689 = vperm.xlu1 %1708, %v2600_v5  }
 0x1ee   :  { %v927_v19 = vpop.xlane.xlu1 %926  ;;  %vm2985_vm9 = vmmov %vm2945_vm0 }
 0x1ef   :  { %v953_v47 = vadd.f32 %v927_v19, %v889_v56  ;;  %v893_v19 = vld [vmem:[#allocation4 + $0x48] sm:$0xff] }
 0x1f1   :  { %969 = vst.msk [vmem:[#allocation4 + $0x28] sm:$0xff] %vm2982_vm14, %v953_v47  ;;  %v2987_v47 = vmov 0 }
 0x1f2   :  { %v544_v4 = vpop.xlane.xlu1 %543 }
 0x1f3   :  { %v2612_v46 = vmax.f32 %v2608_v0, %v544_v4  ;;  %v306_v0 = vadd.s32 96, %v2110_v59 }
 0x1f5   :  { %2983 = vst [vmem:[#allocation29_spill] sm:$0xff] %v2612_v46  ;;  %874 = vst.msk [vmem:[#allocation2 + $0x30] sm:$0xff] %vm2984_vm10, %v2612_v46  ;;  %659 = vperm.xlu1 %1708, %v2612_v46   ;;  %vm346_vm14 = vcmp.ne.s32.totalorder %v306_v0, %v2112_v60  ;;  %v2990_v0 = vmov 0 }
 0x1f6   :  { %v560_v5 = vpop.xlane.xlu1 %559  ;;  %vm2986_vm10 = vmmov %vm2945_vm0 }
 0x1f7   :  { %v2622_v56 = vmax.f32 %v2614_v13, %v560_v5  ;;  %v308_v5 = vadd.s32 112, %v2110_v59 }
 0x1f9   :  { %882 = vst.msk [vmem:[#allocation2 + $0x70] sm:$0xff] %vm2945_vm0, %v2622_v56  ;;  %699 = vperm.xlu1 %1708, %v2622_v56   ;;  %vm2636_vm0 = vmand %vm333_vm1, %vm346_vm14  ;;  %vm348_vm8 = vcmp.ne.s32.totalorder %v308_v5, %v2112_v60  ;;  %vm449_vm14 = vcmp.eq.s32.totalorder %v2204_v27, %v2121_v62  ;;  %v307_v27 = vadd.s32 104, %v2110_v59  ;;  %v309_v5 = vadd.s32 120, %v2110_v59 }
 0x1fa   :  { %v935_v4 = vpop.xlane.xlu1 %934  ;;  %v2988_v47 = vsel %vm2636_vm0, 4294967295, %v2987_v47  ;;  %vm2648_vm6 = vmand %vm333_vm1, %vm348_vm8 }
 0x1fb   :  { %v957_v12 = vadd.f32 %v935_v4, %v893_v19  ;;  %v2991_v0 = vsel %vm2648_vm6, 4294967295, %v2990_v0 }
 0x1fd   :  { %973 = vst.msk [vmem:[#allocation4 + $0x48] sm:$0xff] %vm2985_vm9, %v957_v12  ;;  %vm2989_vm9 = vcmp.eq.s32.totalorder %v2168_v15, %v2121_v62 }
 0x1fe   :  { %v931_v46 = vpop.xlane.xlu1 %930  ;;  %vm463_vm15 = vmand %vm2989_vm9, %vm2636_vm0  ;;  %vm347_vm9 = vcmp.ne.s32.totalorder %v307_v27, %v2112_v60  ;;  %vm2998_vm0 = vcmp.eq.s32.totalorder %v2176_v17, %v2121_v62 }
 0x1ff   :  { %v955_v9 = vadd.f32 %v931_v46, %v891_v55  ;;  %v305_v46 = vadd.s32 88, %v2110_v59 }
 0x201   :  { %971 = vst.msk [vmem:[#allocation4 + $0x38] sm:$0xff] %vm2986_vm10, %v955_v9  ;;  %v2992_v9 = vmov 0.0   ;;  %vm465_vm10 = vmand %vm449_vm14, %vm2648_vm6  ;;  %vm345_vm8 = vcmp.ne.s32.totalorder %v305_v46, %v2112_v60  ;;  %vm2995_vm14 = vcmp.eq.s32.totalorder %v2172_v16, %v2121_v62  ;;  %v896_v16 = vld [vmem:[#allocation4 + $0x60] sm:$0xff] }
 0x202   :  { %v1529_v55 = vsel %vm463_vm15, 1.0, %v2992_v9  ;;  %v2660_v15 = vsel %vm465_vm10, 1.0, %v2992_v9  ;;  %vm2668_vm15 = vmand %vm333_vm1, %vm345_vm8  ;;  %vm349_vm8 = vcmp.ne.s32.totalorder %v309_v5, %v2112_v60 }
 0x203   :  { %v912_v12 = vmul.f32 %v1529_v55, %v2406_v1  ;;  %v914_v19 = vmul.f32 %v2660_v15, %v2430_v22  ;;  %vm462_vm10 = vmand %vm2995_vm14, %vm2668_vm15 }
 0x204   :  { %vm2682_vm6 = vmand %vm333_vm1, %vm347_vm9  ;;  %v1528_v59 = vsel %vm462_vm10, 1.0, %v2992_v9  ;;  %vm450_vm9 = vcmp.eq.s32.totalorder %v2241_v41, %v2121_v62 }
 0x205   :  { %vm464_vm12 = vmand %vm2998_vm0, %vm2682_vm6 }
 0x206   :  { %vm2696_vm14 = vmand %vm333_vm1, %vm349_vm8  ;;  %vm3001_vm1 = vnez %v2940_v61 }
 0x207   :  { %vm466_vm10 = vmand %vm450_vm9, %vm2696_vm14 }
 0x208   :  { %v2710_v60 = vsel %vm466_vm10, 1.0, %v2992_v9 }
 0x209   :  { %v915_v62 = vmul.f32 %v2710_v60, %v2313_v33 }
 0x20c   :  { %940 = vadd.xlane.f32.xlu0 %v912_v12 }
 0x210   :  { %944 = vadd.xlane.f32.xlu0 %v914_v19 }
 0x214   :  { %1000 = vadd.xlane.f32.xlu0 %v2265_v53  ;;  %v911_v53 = vmul.f32 %v1528_v59, %v2294_v20 }
 0x218   :  { %1004 = vadd.xlane.f32.xlu0 %v2303_v6  ;;  %v1530_v6 = vsel %vm464_vm12, 1.0, %v2992_v9 }
 0x219   :  { %v913_v17 = vmul.f32 %v1530_v6, %v2386_v57 }
 0x21c   :  { %1008 = vadd.xlane.f32.xlu0 %v2374_v48 }
 0x21d   :  { %938 = vadd.xlane.f32.xlu1 %v911_v53 }
 0x220   :  { %1012 = vadd.xlane.f32.xlu0 %v2260_v52 }
 0x221   :  { %942 = vadd.xlane.f32.xlu1 %v913_v17 }
 0x224   :  { %1016 = vadd.xlane.f32.xlu0 %v2357_v40 }
 0x225   :  { %946 = vadd.xlane.f32.xlu1 %v915_v62 }
 0x228   :  { %1020 = vadd.xlane.f32.xlu0 %v1529_v55 }
 0x229   :  { %1002 = vadd.xlane.f32.xlu1 %v2369_v44 }
 0x22d   :  { %1006 = vadd.xlane.f32.xlu1 %v2413_v18 }
 0x231   :  { %1010 = vadd.xlane.f32.xlu1 %v2456_v32 }
 0x235   :  { %1014 = vadd.xlane.f32.xlu1 %v2449_v30 }
 0x239   :  { %1018 = vadd.xlane.f32.xlu1 %v1528_v59 }
 0x23c   :  { %v635_v41 = vpop.permute.xlu0 %634 }
 0x23d   :  { %v708_v52 = vsub.f32 %v2200_v23, %v635_v41  ;;  %1022 = vadd.xlane.f32.xlu1 %v1530_v6  ;;  %v630_v48 = vpop.permute.xlu1 %629 }
 0x23e   :  { %v707_v46 = vsub.f32 %v2206_v28, %v630_v48 }
 0x23f   :  { %v725_v19 = vmul.f32 1.442695, %v708_v52 }
 0x240   :  { %v723_v40 = vmul.f32 1.442695, %v707_v46  ;;  %v675_v27 = vpop.permute.xlu0 %674 }
 0x241   :  { %1709 = vpow2.f32 %v725_v19  ;;  %v716_v44 = vsub.f32 %v2202_v24, %v675_v27 }
 0x242   :  { %1711 = vpow2.f32 %v723_v40 }
 0x243   :  { %v741_v18 = vmul.f32 1.442695, %v716_v44 }
 0x244   :  { %v670_v55 = vpop.permute.xlu1 %669 }
 0x245   :  { %1713 = vpow2.f32 %v741_v18  ;;  %v715_v30 = vsub.f32 %v2245_v43, %v670_v55 }
 0x247   :  { %v739_v32 = vmul.f32 1.442695, %v715_v30 }
 0x249   :  { %1715 = vpow2.f32 %v739_v32 }
 0x24b   :  { %v1710_v5 = vpop.eup %1709 }
 0x24c   :  { %v645_v23 = vpop.permute.xlu1 %644  ;;  %v756_v59 = vsel %vm2138_vm7, %v1710_v5, 0.0  ;;  %v1712_v28 = vpop.eup %1711  ;;  %vm3003_vm7 = vnez %v2932_v58 }
 0x24d   :  { %v710_v53 = vsub.f32 %v2280_v2, %v645_v23  ;;  %805 = vadd.xlane.f32.xlu0 %v756_v59  ;;  %v755_v43 = vsel %vm2125_vm3, %v1712_v28, 0.0  ;;  %vm3002_vm3 = vnez %v2944_v26 }
 0x24f   :  { %v1714_v6 = vpop.eup %1713  ;;  %v729_v17 = vmul.f32 1.442695, %v710_v53 }
 0x250   :  { %v685_v24 = vpop.permute.xlu0 %684  ;;  %v764_v62 = vsel %vm2421_vm11, %v1714_v6, 0.0 }
 0x251   :  { %1717 = vpow2.f32 %v729_v17  ;;  %v718_v41 = vsub.f32 %v2294_v20, %v685_v24  ;;  %821 = vadd.xlane.f32.xlu1 %v764_v62  ;;  %803 = vadd.xlane.f32.xlu0 %v755_v43 }
 0x253   :  { %v1716_v3 = vpop.eup %1715  ;;  %v745_v52 = vmul.f32 1.442695, %v718_v41 }
 0x254   :  { %v640_v48 = vpop.permute.xlu1 %639  ;;  %v763_v2 = vsel %vm2221_vm5, %v1716_v3, 0.0  ;;  %vm3006_vm5 = vnez %v2991_v0 }
 0x255   :  { %1719 = vpow2.f32 %v745_v52  ;;  %v709_v46 = vsub.f32 %v2254_v49, %v640_v48  ;;  %819 = vadd.xlane.f32.xlu0 %v763_v2 }
 0x257   :  { %v727_v50 = vmul.f32 1.442695, %v709_v46 }
 0x258   :  { %v680_v19 = vpop.permute.xlu1 %679 }
 0x259   :  { %1721 = vpow2.f32 %v727_v50  ;;  %v717_v63 = vsub.f32 %v2347_v39, %v680_v19 }
 0x25b   :  { %v1718_v40 = vpop.eup %1717  ;;  %v743_v27 = vmul.f32 1.442695, %v717_v63 }
 0x25c   :  { %v758_v20 = vsel %vm2329_vm13, %v1718_v40, 0.0  ;;  %vm3004_vm13 = vnez %v2988_v47  ;;  %v898_v47 = vld [vmem:[#allocation4 + $0x70] sm:$0xff] }
 0x25d   :  { %1723 = vpow2.f32 %v743_v27  ;;  %809 = vadd.xlane.f32.xlu1 %v758_v20 }
 0x25f   :  { %v1720_v44 = vpop.eup %1719 }
 0x260   :  { %v655_v18 = vpop.permute.xlu0 %654  ;;  %v766_v31 = vsel %vm2668_vm15, %v1720_v44, 0.0 }
 0x261   :  { %v712_v49 = vsub.f32 %v2377_v51, %v655_v18  ;;  %825 = vadd.xlane.f32.xlu1 %v766_v31 }
 0x263   :  { %v1722_v55 = vpop.eup %1721  ;;  %v733_v30 = vmul.f32 1.442695, %v712_v49  ;;  %v982_v49 = vld [vmem:[#allocation5 + $0x10] sm:$0xff] }
 0x264   :  { %v695_v32 = vpop.permute.xlu0 %694  ;;  %v757_v39 = vsel %vm2210_vm2, %v1722_v55, 0.0  ;;  %vm3005_vm2 = vnez %v2938_v38 }
 0x265   :  { %1725 = vpow2.f32 %v733_v30  ;;  %v720_v36 = vsub.f32 %v2386_v57, %v695_v32  ;;  %807 = vadd.xlane.f32.xlu0 %v757_v39  ;;  %v984_v30 = vld [vmem:[#allocation5 + $0x20] sm:$0xff]  ;;  %v986_v39 = vld [vmem:[#allocation5 + $0x30] sm:$0xff] }
 0x267   :  { %v1724_v5 = vpop.eup %1723  ;;  %v749_v23 = vmul.f32 1.442695, %v720_v36 }
 0x268   :  { %v665_v59 = vpop.permute.xlu0 %664  ;;  %v650_v28 = vpop.permute.xlu1 %649  ;;  %v765_v4 = vsel %vm2321_vm4, %v1724_v5, 0.0  ;;  %vm3007_vm4 = vcmask 7168  }
 0x269   :  { %1727 = vpow2.f32 %v749_v23  ;;  %v714_v51 = vsub.f32 %v2300_v25, %v665_v59  ;;  %v711_v53 = vsub.f32 %v2291_v8, %v650_v28  ;;  %823 = vadd.xlane.f32.xlu0 %v765_v4  ;;  %vm3008_vm12 = vmmov %vm3007_vm4  ;;  %v988_v28 = vld [vmem:[#allocation5 + $0x40] sm:$0xff]  ;;  %v897_v4 = vld [vmem:[#allocation4 + $0x68] sm:$0xff] }
 0x26a   :  { %vm3009_vm11 = vmmov %vm3007_vm4 }
 0x26b   :  { %v737_v6 = vmul.f32 1.442695, %v714_v51  ;;  %v731_v29 = vmul.f32 1.442695, %v711_v53  ;;  %vm3011_vm0 = vmmov %vm3007_vm4 }
 0x26c   :  { %v705_v17 = vpop.permute.xlu0 %704  ;;  %v690_v24 = vpop.permute.xlu1 %689  ;;  %vm3012_vm15 = vmmov %vm3011_vm0 }
 0x26d   :  { %1729 = vpow2.f32 %v737_v6  ;;  %v722_v57 = vsub.f32 %v2313_v33, %v705_v17  ;;  %v719_v62 = vsub.f32 %v2406_v1, %v690_v24  ;;  %v990_v17 = vld [vmem:[#allocation5 + $0x50] sm:$0xff]  ;;  %vm3013_vm8 = vmmov %vm3011_vm0  ;;  %v899_v24 = vld [vmem:[#allocation4 + $0x78] sm:$0xff] }
 0x26e   :  { %1731 = vpow2.f32 %v731_v29  ;;  %vm3015_vm9 = vmmov %vm3011_vm0 }
 0x26f   :  { %v1726_v43 = vpop.eup %1725  ;;  %v753_v41 = vmul.f32 1.442695, %v722_v57  ;;  %v747_v35 = vmul.f32 1.442695, %v719_v62  ;;  %vm3016_vm10 = vmmov %vm3011_vm0 }
 0x270   :  { %v760_v3 = vsel %vm3001_vm1, %v1726_v43, 0.0  ;;  %vm3017_vm1 = vmmov %vm3011_vm0 }
 0x271   :  { %1733 = vpow2.f32 %v753_v41  ;;  %813 = vadd.xlane.f32.xlu1 %v760_v3  ;;  %v983_v3 = vld [vmem:[#allocation5 + $0x18] sm:$0xff] }
 0x272   :  { %1735 = vpow2.f32 %v747_v35  ;;  %v992_v35 = vld [vmem:[#allocation5 + $0x60] sm:$0xff] }
 0x273   :  { %v1728_v8 = vpop.eup %1727 }
 0x274   :  { %v660_v25 = vpop.permute.xlu1 %659  ;;  %v768_v52 = vsel %vm2682_vm6, %v1728_v8, 0.0  ;;  %vm3010_vm6 = vmmov %vm3007_vm4 }
 0x275   :  { %v713_v48 = vsub.f32 %v2361_v37, %v660_v25  ;;  %829 = vadd.xlane.f32.xlu1 %v768_v52 }
 0x277   :  { %v1730_v33 = vpop.eup %1729  ;;  %v735_v1 = vmul.f32 1.442695, %v713_v48 }
 0x278   :  { %v1732_v2 = vpop.eup %1731  ;;  %v700_v46 = vpop.permute.xlu1 %699  ;;  %v762_v50 = vsel %vm3002_vm3, %v1730_v33, 0.0  ;;  %v985_v33 = vld [vmem:[#allocation5 + $0x28] sm:$0xff]  ;;  %vm3018_vm3 = vmmov %vm3011_vm0 }
 0x279   :  { %1737 = vpow2.f32 %v735_v1  ;;  %v721_v61 = vsub.f32 %v2430_v22, %v700_v46  ;;  %817 = vadd.xlane.f32.xlu1 %v762_v50  ;;  %v759_v19 = vsel %vm3003_vm7, %v1732_v2, 0.0  ;;  %v987_v46 = vld [vmem:[#allocation5 + $0x38] sm:$0xff]  ;;  %vm3019_vm7 = vmmov %vm3011_vm0 }
 0x27a   :  { %811 = vadd.xlane.f32.xlu0 %v759_v19  ;;  %v989_v19 = vld [vmem:[#allocation5 + $0x48] sm:$0xff] }
 0x27b   :  { %v1734_v12 = vpop.eup %1733  ;;  %v751_v63 = vmul.f32 1.442695, %v721_v61 }
 0x27c   :  { %v1736_v40 = vpop.eup %1735  ;;  %v770_v37 = vsel %vm2696_vm14, %v1734_v12, 0.0  ;;  %vm3014_vm14 = vmmov %vm3011_vm0 }
 0x27d   :  { %1739 = vpow2.f32 %v751_v63  ;;  %833 = vadd.xlane.f32.xlu1 %v770_v37  ;;  %v767_v26 = vsel %vm3004_vm13, %v1736_v40, 0.0  ;;  %vm3020_vm13 = vmmov %vm3011_vm0  ;;  %v991_v40 = vld [vmem:[#allocation5 + $0x58] sm:$0xff] }
 0x27e   :  { %827 = vadd.xlane.f32.xlu0 %v767_v26 }
 0x281   :  { %1026 = vadd.xlane.f32.xlu1 %v2710_v60 }
 0x283   :  { %v1738_v22 = vpop.eup %1737 }
 0x284   :  { %v761_v58 = vsel %vm3005_vm2, %v1738_v22, 0.0  ;;  %vm3021_vm2 = vmmov %vm3011_vm0  ;;  %v3022_v22 = vsub.f32 %v2460_v34, %v2465_v42  ;;  %v3028_v34 = vld [vmem:[#allocation10_spill] sm:$0xff]  ;;  %v3029_v42 = vld [vmem:[#allocation11_spill] sm:$0xff] }
 0x285   :  { %815 = vadd.xlane.f32.xlu0 %v761_v58 }
 0x286   :  { %v597_v58 = vmul.f32 1.442695, %v3022_v22  ;;  %v1288_v22 = vld [vmem:[%s2886_s0 + $0x8] sm:$0xff] }
 0x287   :  { %v1740_v27 = vpop.eup %1739 }
 0x288   :  { %v769_v20 = vsel %vm3006_vm5, %v1740_v27, 0.0  ;;  %v993_v27 = vld [vmem:[#allocation5 + $0x68] sm:$0xff]  ;;  %vm3023_vm5 = vmmov %vm3011_vm0  ;;  %1741 = vpow2.f32 %v597_v58 }
 0x289   :  { %831 = vadd.xlane.f32.xlu0 %v769_v20  ;;  %v1160_v58 = vld [vmem:[#allocation4 + $0x8] sm:$0xff] }
 0x28d   :  { %1024 = vadd.xlane.f32.xlu0 %v2660_v15  ;;  %v895_v15 = vld [vmem:[#allocation4 + $0x58] sm:$0xff] }
 0x299   :  { %v941_v44 = vpop.xlane.xlu0 %940 }
 0x29a   :  { %v960_v18 = vadd.f32 %v941_v44, %v896_v16  ;;  %v3024_v16 = vsub.f32 %v2462_v14, %v2468_v45  ;;  %v772_v14 = vld [vmem:[#allocation3 + $0x8] sm:$0xff]  ;;  %v3031_v45 = vld [vmem:[#allocation12_spill] sm:$0xff] }
 0x29c   :  { %976 = vst.msk [vmem:[#allocation4 + $0x60] sm:$0xff] %vm3007_vm4, %v960_v18  ;;  %v595_v44 = vmul.f32 1.442695, %v3024_v16  ;;  %vm3027_vm4 = vmmov %vm3011_vm0 }
 0x29d   :  { %v945_v31 = vpop.xlane.xlu0 %944 }
 0x29e   :  { %v962_v60 = vadd.f32 %v945_v31, %v898_v47  ;;  %v3025_v47 = vld [vmem:[#allocation9_spill] sm:$0xff]  ;;  %1743 = vpow2.f32 %v595_v44 }
 0x29f   :  { %v3026_v31 = vsub.f32 %v2470_v54, %v3025_v47 }
 0x2a0   :  { %978 = vst.msk [vmem:[#allocation4 + $0x70] sm:$0xff] %vm3008_vm12, %v962_v60  ;;  %vm3037_vm12 = vmmov %vm3011_vm0 }
 0x2a1   :  { %v1001_v38 = vpop.xlane.xlu0 %1000  ;;  %v613_v60 = vmul.f32 1.442695, %v3026_v31 }
 0x2a2   :  { %v1030_v55 = vadd.f32 %v1001_v38, %v982_v49  ;;  %v3030_v49 = vsub.f32 %v3028_v34, %v3029_v42  ;;  %v1159_v42 = vld [vmem:[#allocation4] sm:$0xff] }
 0x2a3   :  { %1745 = vpow2.f32 %v613_v60  ;;  %v1287_v60 = vld [vmem:[%s2886_s0] sm:$0xff] }
 0x2a4   :  { %1046 = vst.msk [vmem:[#allocation5 + $0x10] sm:$0xff] %vm3009_vm11, %v1030_v55  ;;  %v611_v38 = vmul.f32 1.442695, %v3030_v49  ;;  %v1742_v55 = vpop.eup %1741  ;;  %vm3041_vm11 = vmmov %vm3011_vm0  ;;  %v3045_v49 = vsub.f32 %v2564_v7, %v2569_v11 }
 0x2a5   :  { %v1005_v0 = vpop.xlane.xlu0 %1004 }
 0x2a6   :  { %v1032_v32 = vadd.f32 %v1005_v0, %v984_v30  ;;  %1747 = vpow2.f32 %v611_v38  ;;  %v2798_v30 = vld [vmem:[#allocation5 + $0x8] sm:$0xff]  ;;  %v3032_v0 = vld [vmem:[#allocation13_spill] sm:$0xff]  ;;  %v605_v38 = vmul.f32 1.442695, %v3045_v49 }
 0x2a7   :  { %v1096_v54 = vmax.f32 %v2798_v30, 1.0  ;;  %v784_v49 = vld [vmem:[#allocation3 + $0x68] sm:$0xff] }
 0x2a8   :  { %1048 = vst.msk [vmem:[#allocation5 + $0x20] sm:$0xff] %vm3010_vm6, %v1032_v32  ;;  %v3033_v32 = vsub.f32 %v3031_v45, %v3032_v0  ;;  %vm3042_vm6 = vmmov %vm3011_vm0 }
 0x2a9   :  { %v1009_v36 = vpop.xlane.xlu0 %1008 }
 0x2aa   :  { %v1034_v5 = vadd.f32 %v1009_v36, %v986_v39  ;;  %v939_v23 = vpop.xlane.xlu1 %938  ;;  %v601_v39 = vmul.f32 1.442695, %v3033_v32  ;;  %v788_v36 = vmul.f32 %v1742_v55, %v772_v14  ;;  %v1192_v32 = vld [vmem:[#allocation2 + $0x8] sm:$0xff] }
 0x2ab   :  { %v959_v59 = vadd.f32 %v939_v23, %v895_v15  ;;  %v1744_v15 = vpop.eup %1743  ;;  %v2804_v23 = vld [vmem:[#allocation5] sm:$0xff] }
 0x2ac   :  { %1050 = vst.msk [vmem:[#allocation5 + $0x30] sm:$0xff] %vm3011_vm0, %v1034_v5  ;;  %1749 = vpow2.f32 %v601_v39 }
 0x2ad   :  { %975 = vst.msk [vmem:[#allocation4 + $0x58] sm:$0xff] %vm3012_vm15, %v959_v59  ;;  %v1013_v51 = vpop.xlane.xlu0 %1012  ;;  %v1746_v5 = vpop.eup %1745  ;;  %1751 = vrcp.f32 %v1096_v54  ;;  %vm1080_vm15 = vcmp.gt.f32.partialorder %v2798_v30, 0.0  ;;  %v773_v54 = vld [vmem:[#allocation3 + $0x10] sm:$0xff] }
 0x2ae   :  { %v1036_v53 = vadd.f32 %v1013_v51, %v988_v28  ;;  %v943_v6 = vpop.xlane.xlu1 %942  ;;  %v771_v28 = vld [vmem:[#allocation3] sm:$0xff] }
 0x2af   :  { %v961_v29 = vadd.f32 %v943_v6, %v897_v4  ;;  %v780_v4 = vld [vmem:[#allocation3 + $0x48] sm:$0xff]  ;;  %v3035_v6 = vld [vmem:[#allocation16_spill] sm:$0xff] }
 0x2b0   :  { %1052 = vst.msk [vmem:[#allocation5 + $0x40] sm:$0xff] %vm3013_vm8, %v1036_v53  ;;  %v3034_v53 = vld [vmem:[#allocation14_spill] sm:$0xff]  ;;  %vm1304_vm8 = vcmp.eq.s32.totalorder %v1288_v22, 0 }
 0x2b1   :  { %977 = vst.msk [vmem:[#allocation4 + $0x68] sm:$0xff] %vm3014_vm14, %v961_v29  ;;  %v1017_v57 = vpop.xlane.xlu0 %1016  ;;  %v3036_v29 = vsub.f32 %v3034_v53, %v3035_v6  ;;  %vm1368_vm14 = vcmp.eq.s32.totalorder %v1288_v22, 1  ;;  %v1534_v55 = vsel %vm1304_vm8, 1.0, %v2992_v9  ;;  %v3059_v22 = vld [vmem:[#allocation21_spill] sm:$0xff]  ;;  %vm3074_vm8 = vmmov %vm3011_vm0 }
 0x2b2   :  { %v1038_v62 = vadd.f32 %v1017_v57, %v990_v17  ;;  %v947_v43 = vpop.xlane.xlu1 %946  ;;  %v787_v57 = vmul.f32 %v1744_v15, %v771_v28  ;;  %v1550_v14 = vsel %vm1368_vm14, 1.0, %v2992_v9  ;;  %vm3075_vm14 = vmmov %vm3011_vm0 }
 0x2b3   :  { %v963_v41 = vadd.f32 %v947_v43, %v899_v24  ;;  %v617_v17 = vmul.f32 1.442695, %v3036_v29  ;;  %v1095_v24 = vmax.f32 %v2804_v23, 1.0  ;;  %v1748_v43 = vpop.eup %1747 }
 0x2b4   :  { %1054 = vst.msk [vmem:[#allocation5 + $0x50] sm:$0xff] %vm3015_vm9, %v1038_v62  ;;  %v796_v62 = vmul.f32 %v1746_v5, %v780_v4  ;;  %vm1079_vm9 = vcmp.gt.f32.partialorder %v2804_v23, 0.0 }
 0x2b5   :  { %979 = vst.msk [vmem:[#allocation4 + $0x78] sm:$0xff] %vm3016_vm10, %v963_v41  ;;  %v1021_v8 = vpop.xlane.xlu0 %1020  ;;  %1753 = vpow2.f32 %v617_v17  ;;  %vm3046_vm10 = vmmov %vm3011_vm0 }
 0x2b6   :  { %v1040_v25 = vadd.f32 %v1021_v8, %v992_v35  ;;  %v1003_v52 = vpop.xlane.xlu1 %1002  ;;  %1755 = vrcp.f32 %v1095_v24 }
 0x2b7   :  { %v1031_v48 = vadd.f32 %v1003_v52, %v983_v3  ;;  %v779_v3 = vld [vmem:[#allocation3 + $0x40] sm:$0xff]  ;;  %v3038_v52 = vld [vmem:[#allocation18_spill] sm:$0xff] }
 0x2b8   :  { %1056 = vst.msk [vmem:[#allocation5 + $0x60] sm:$0xff] %vm3017_vm1, %v1040_v25  ;;  %vm1303_vm1 = vcmp.eq.s32.totalorder %v1287_v60, 0 }
 0x2b9   :  { %1047 = vst.msk [vmem:[#allocation5 + $0x18] sm:$0xff] %vm3018_vm3, %v1031_v48  ;;  %v3039_v48 = vld [vmem:[#allocation20_spill] sm:$0xff]  ;;  %vm1367_vm3 = vcmp.eq.s32.totalorder %v1287_v60, 1  ;;  %v1533_v6 = vsel %vm1303_vm1, 1.0, %v2992_v9  ;;  %vm3078_vm1 = vmmov %vm3011_vm0 }
 0x2ba   :  { %v1007_v1 = vpop.xlane.xlu1 %1006  ;;  %v1549_v29 = vsel %vm1367_vm3, 1.0, %v2992_v9  ;;  %v3053_v9 = vld [vmem:[#allocation24_spill] sm:$0xff] }
 0x2bb   :  { %v1033_v2 = vadd.f32 %v1007_v1, %v985_v33  ;;  %v3040_v33 = vsub.f32 %v3038_v52, %v3039_v48 }
 0x2bd   :  { %1049 = vst.msk [vmem:[#allocation5 + $0x28] sm:$0xff] %vm3019_vm7, %v1033_v2  ;;  %v599_v1 = vmul.f32 1.442695, %v3040_v33  ;;  %v795_v2 = vmul.f32 %v1748_v43, %v779_v3  ;;  %vm3049_vm7 = vmmov %vm3011_vm0 }
 0x2be   :  { %v1011_v50 = vpop.xlane.xlu1 %1010 }
 0x2bf   :  { %v1035_v61 = vadd.f32 %v1011_v50, %v987_v46  ;;  %1757 = vpow2.f32 %v599_v1  ;;  %v1415_v1 = vadd.f32 %v1549_v29, %v1533_v6 }
 0x2c1   :  { %1051 = vst.msk [vmem:[#allocation5 + $0x38] sm:$0xff] %vm3020_vm13, %v1035_v61  ;;  %v3043_v61 = vld [vmem:[#allocation22_spill] sm:$0xff]  ;;  %vm3056_vm13 = vmmov %vm3011_vm0 }
 0x2c2   :  { %v1015_v12 = vpop.xlane.xlu1 %1014 }
 0x2c3   :  { %v1037_v63 = vadd.f32 %v1015_v12, %v989_v19  ;;  %v3044_v19 = vsub.f32 %v2544_v21, %v3043_v61 }
 0x2c5   :  { %1053 = vst.msk [vmem:[#allocation5 + $0x48] sm:$0xff] %vm3021_vm2, %v1037_v63  ;;  %v615_v12 = vmul.f32 1.442695, %v3044_v19  ;;  %vm3057_vm2 = vmmov %vm3011_vm0 }
 0x2c6   :  { %v1019_v37 = vpop.xlane.xlu1 %1018 }
 0x2c7   :  { %v1039_v26 = vadd.f32 %v1019_v37, %v991_v40  ;;  %v1750_v40 = vpop.eup %1749  ;;  %v774_v37 = vld [vmem:[#allocation3 + $0x18] sm:$0xff] }
 0x2c9   :  { %1055 = vst.msk [vmem:[#allocation5 + $0x58] sm:$0xff] %vm3023_vm5, %v1039_v26  ;;  %v1752_v26 = vpop.eup %1751  ;;  %vm3064_vm5 = vmmov %vm3011_vm0 }
 0x2ca   :  { %v1023_v20 = vpop.xlane.xlu1 %1022  ;;  %v1754_v21 = vpop.eup %1753  ;;  %v1144_v16 = vsel %vm1080_vm15, %v1752_v26, 0.0  ;;  %v3058_v26 = vld [vmem:[#allocation19_spill] sm:$0xff] }
 0x2cb   :  { %v1041_v18 = vadd.f32 %v1023_v20, %v993_v27  ;;  %v790_v20 = vmul.f32 %v1750_v40, %v774_v37  ;;  %v1756_v47 = vpop.eup %1755  ;;  %v1176_v31 = vmul.f32 %v1160_v58, %v1144_v16  ;;  %v3060_v58 = vsub.f32 %v3058_v26, %v3059_v22  ;;  %v3062_v16 = vld [vmem:[#allocation27_spill] sm:$0xff] }
 0x2cc   :  { %v1758_v0 = vpop.eup %1757  ;;  %v1143_v39 = vsel %vm1079_vm9, %v1756_v47, 0.0 }
 0x2cd   :  { %1057 = vst.msk [vmem:[#allocation5 + $0x68] sm:$0xff] %vm3027_vm4, %v1041_v18  ;;  %v782_v18 = vld [vmem:[#allocation3 + $0x58] sm:$0xff]  ;;  %v1175_v5 = vmul.f32 %v1159_v42, %v1143_v39  ;;  %v1208_v7 = vsub.f32 %v1176_v31, %v1192_v32  ;;  %v789_v17 = vmul.f32 %v1758_v0, %v773_v54  ;;  %v776_v31 = vld [vmem:[#allocation3 + $0x28] sm:$0xff]  ;;  %vm3065_vm4 = vmmov %vm3011_vm0 }
 0x2ce   :  { %v798_v45 = vmul.f32 %v1754_v21, %v782_v18  ;;  %v3061_v21 = vld [vmem:[#allocation26_spill] sm:$0xff] }
 0x2da   :  { %v806_v59 = vpop.xlane.xlu0 %805 }
 0x2db   :  { %v836_v51 = vadd.f32 %v806_v59, %v788_v36  ;;  %v3047_v59 = vld [vmem:[#allocation23_spill] sm:$0xff] }
 0x2dc   :  { %v3048_v28 = vsub.f32 %v2571_v10, %v3047_v59 }
 0x2dd   :  { %853 = vst.msk [vmem:[#allocation3 + $0x8] sm:$0xff] %vm3037_vm12, %v836_v51  ;;  %v1416_v51 = vadd.f32 %v1550_v14, %v1534_v55  ;;  %v3066_v55 = vld [vmem:[#allocation28_spill] sm:$0xff]  ;;  %v3067_v14 = vld [vmem:[#allocation29_spill] sm:$0xff]  ;;  %vm3069_vm12 = vmmov %vm3011_vm0 }
 0x2de   :  { %v804_v41 = vpop.xlane.xlu0 %803  ;;  %v822_v35 = vpop.xlane.xlu1 %821  ;;  %v621_v4 = vmul.f32 1.442695, %v3048_v28 }
 0x2df   :  { %v835_v8 = vadd.f32 %v804_v41, %v787_v57  ;;  %v844_v25 = vadd.f32 %v822_v35, %v796_v62  ;;  %v1191_v57 = vld [vmem:[#allocation2] sm:$0xff]  ;;  %v781_v41 = vld [vmem:[#allocation3 + $0x50] sm:$0xff] }
 0x2e0   :  { %v1207_v3 = vsub.f32 %v1175_v5, %v1191_v57  ;;  %v775_v5 = vld [vmem:[#allocation3 + $0x20] sm:$0xff] }
 0x2e1   :  { %852 = vst.msk [vmem:[#allocation3] sm:$0xff] %vm3041_vm11, %v835_v8  ;;  %v3050_v8 = vld [vmem:[#allocation15_spill] sm:$0xff]  ;;  %vm3071_vm11 = vmmov %vm3011_vm0 }
 0x2e2   :  { %861 = vst.msk [vmem:[#allocation3 + $0x48] sm:$0xff] %vm3042_vm6, %v844_v25  ;;  %v820_v46 = vpop.xlane.xlu0 %819  ;;  %v3051_v25 = vld [vmem:[#allocation17_spill] sm:$0xff]  ;;  %vm3072_vm6 = vmmov %vm3011_vm0 }
 0x2e3   :  { %v843_v50 = vadd.f32 %v820_v46, %v795_v2  ;;  %v3052_v10 = vsub.f32 %v3050_v8, %v3051_v25  ;;  %v3054_v46 = vld [vmem:[#allocation25_spill] sm:$0xff] }
 0x2e4   :  { %v1224_v63 = vld [vmem:[#allocation3 + $0x8] sm:$0xff] }
 0x2e5   :  { %1759 = vlog2.f32 %v1224_v63  ;;  %860 = vst.msk [vmem:[#allocation3 + $0x40] sm:$0xff] %vm3011_vm0, %v843_v50  ;;  %v609_v52 = vmul.f32 1.442695, %v3052_v10  ;;  %v3055_v50 = vsub.f32 %v3053_v9, %v3054_v46  ;;  %v777_v10 = vld [vmem:[#allocation3 + $0x30] sm:$0xff] }
 0x2e6   :  { %1761 = vpow2.f32 %v615_v12 }
 0x2e7   :  { %v603_v61 = vmul.f32 1.442695, %v3055_v50 }
 0x2e8   :  { %v1223_v27 = vld [vmem:[#allocation3] sm:$0xff] }
 0x2e9   :  { %1763 = vlog2.f32 %v1223_v27  ;;  %v625_v27 = vmul.f32 1.442695, %v3060_v58 }
 0x2ea   :  { %v810_v44 = vpop.xlane.xlu1 %809  ;;  %1765 = vpow2.f32 %v605_v38 }
 0x2eb   :  { %v838_v34 = vadd.f32 %v810_v44, %v790_v20  ;;  %1767 = vpow2.f32 %v621_v4  ;;  %v3063_v44 = vsub.f32 %v3061_v21, %v3062_v16 }
 0x2ec   :  { %1769 = vpow2.f32 %v609_v52 }
 0x2ed   :  { %855 = vst.msk [vmem:[#allocation3 + $0x18] sm:$0xff] %vm3046_vm10, %v838_v34  ;;  %1771 = vpow2.f32 %v603_v61  ;;  %v619_v30 = vmul.f32 1.442695, %v3063_v44  ;;  %vm3077_vm10 = vmmov %vm3011_vm0 }
 0x2ee   :  { %v826_v15 = vpop.xlane.xlu1 %825  ;;  %1773 = vpow2.f32 %v625_v27 }
 0x2ef   :  { %v1760_v36 = vpop.eup %1759  ;;  %v846_v11 = vadd.f32 %v826_v15, %v798_v45  ;;  %1775 = vpow2.f32 %v619_v30  ;;  %v3068_v45 = vsub.f32 %v3066_v55, %v3067_v14  ;;  %v778_v15 = vld [vmem:[#allocation3 + $0x38] sm:$0xff] }
 0x2f0   :  { %v1242_v53 = vmul.f32 0.6931472, %v1760_v36  ;;  %v1762_v24 = vpop.eup %1761 }
 0x2f1   :  { %863 = vst.msk [vmem:[#allocation3 + $0x58] sm:$0xff] %vm3049_vm7, %v846_v11  ;;  %v797_v19 = vmul.f32 %v1762_v24, %v781_v41  ;;  %v607_v0 = vmul.f32 1.442695, %v3068_v45  ;;  %v783_v24 = vld [vmem:[#allocation3 + $0x60] sm:$0xff] }
 0x2f2   :  { %v1272_v62 = vsub.f32 %v1208_v7, %v1242_v53  ;;  %v808_v43 = vpop.xlane.xlu0 %807  ;;  %v3070_v7 = vsub.f32 %v2614_v13, %v2622_v56  ;;  %v786_v53 = vld [vmem:[#allocation3 + $0x78] sm:$0xff] }
 0x2f3   :  { %v1764_v35 = vpop.eup %1763  ;;  %v837_v48 = vadd.f32 %v808_v43, %v789_v17  ;;  %1777 = vpow2.f32 %v607_v0 }
 0x2f4   :  { %v1464_v33 = vmul.f32 %v1416_v51, %v1272_v62  ;;  %v1240_v2 = vmul.f32 0.6931472, %v1764_v35  ;;  %v1766_v18 = vpop.eup %1765  ;;  %v623_v11 = vmul.f32 1.442695, %v3070_v7 }
 0x2f5   :  { %854 = vst.msk [vmem:[#allocation3 + $0x10] sm:$0xff] %vm3056_vm13, %v837_v48  ;;  %v792_v60 = vmul.f32 %v1766_v18, %v776_v31  ;;  %v1768_v34 = vpop.eup %1767 }
 0x2f6   :  { %v1480_v12 = vsel %vm1080_vm15, %v1464_v33, 0.0  ;;  %v1271_v63 = vsub.f32 %v1207_v3, %v1240_v2  ;;  %v824_v40 = vpop.xlane.xlu0 %823  ;;  %v800_v23 = vmul.f32 %v1768_v34, %v784_v49  ;;  %v1770_v32 = vpop.eup %1769  ;;  %1779 = vpow2.f32 %v623_v11  ;;  %v995_v3 = vld [vmem:[#allocation5 + $0x78] sm:$0xff]  ;;  %vm3073_vm15 = vmmov %vm3011_vm0  ;;  %v785_v2 = vld [vmem:[#allocation3 + $0x70] sm:$0xff] }
 0x2f7   :  { %1496 = vst.msk [vmem:[%s2890_s4 + $0x8] sm:$0xff] %vm3057_vm2, %v1480_v12  ;;  %v845_v37 = vadd.f32 %v824_v40, %v797_v19  ;;  %v1772_v54 = vpop.eup %1771  ;;  %v794_v59 = vmul.f32 %v1770_v32, %v778_v15  ;;  %v994_v19 = vld [vmem:[#allocation5 + $0x70] sm:$0xff] }
 0x2f8   :  { %v1463_v20 = vmul.f32 %v1415_v1, %v1271_v63  ;;  %v1774_v28 = vpop.eup %1773  ;;  %v791_v4 = vmul.f32 %v1772_v54, %v775_v5 }
 0x2f9   :  { %862 = vst.msk [vmem:[#allocation3 + $0x50] sm:$0xff] %vm3064_vm5, %v845_v37  ;;  %v1776_v6 = vpop.eup %1775  ;;  %v802_v62 = vmul.f32 %v1774_v28, %v786_v53 }
 0x2fa   :  { %v1479_v47 = vsel %vm1079_vm9, %v1463_v20, 0.0  ;;  %v799_v13 = vmul.f32 %v1776_v6, %v783_v24  ;;  %vm3076_vm9 = vmmov %vm3011_vm0 }
 0x2fb   :  { %1495 = vst.msk [vmem:[%s2890_s4] sm:$0xff] %vm3065_vm4, %v1479_v47 }
 0x2fd   :  { %v1778_v8 = vpop.eup %1777 }
 0x2fe   :  { %v814_v42 = vpop.xlane.xlu1 %813  ;;  %v793_v48 = vmul.f32 %v1778_v8, %v777_v10 }
 0x2ff   :  { %v840_v38 = vadd.f32 %v814_v42, %v792_v60 }
 0x300   :  { %v1780_v33 = vpop.eup %1779 }
 0x301   :  { %857 = vst.msk [vmem:[#allocation3 + $0x28] sm:$0xff] %vm3069_vm12, %v840_v38  ;;  %v801_v46 = vmul.f32 %v1780_v33, %v785_v2 }
 0x302   :  { %v830_v39 = vpop.xlane.xlu1 %829 }
 0x303   :  { %v848_v36 = vadd.f32 %v830_v39, %v800_v23 }
 0x305   :  { %865 = vst.msk [vmem:[#allocation3 + $0x68] sm:$0xff] %vm3071_vm11, %v848_v36 }
 0x306   :  { %v818_v51 = vpop.xlane.xlu1 %817 }
 0x307   :  { %v812_v29 = vpop.xlane.xlu0 %811  ;;  %v842_v17 = vadd.f32 %v818_v51, %v794_v59 }
 0x308   :  { %v839_v57 = vadd.f32 %v812_v29, %v791_v4 }
 0x309   :  { %859 = vst.msk [vmem:[#allocation3 + $0x38] sm:$0xff] %vm3072_vm6, %v842_v17 }
 0x30a   :  { %856 = vst.msk [vmem:[#allocation3 + $0x20] sm:$0xff] %vm3011_vm0, %v839_v57  ;;  %v834_v56 = vpop.xlane.xlu1 %833 }
 0x30b   :  { %v828_v43 = vpop.xlane.xlu0 %827  ;;  %v850_v41 = vadd.f32 %v834_v56, %v802_v62 }
 0x30c   :  { %v847_v35 = vadd.f32 %v828_v43, %v799_v13 }
 0x30d   :  { %867 = vst.msk [vmem:[#allocation3 + $0x78] sm:$0xff] %vm3073_vm15, %v850_v41 }
 0x30e   :  { %864 = vst.msk [vmem:[#allocation3 + $0x60] sm:$0xff] %vm3074_vm8, %v847_v35  ;;  %v1027_v25 = vpop.xlane.xlu1 %1026 }
 0x30f   :  { %v1043_v52 = vadd.f32 %v1027_v25, %v995_v3 }
 0x311   :  { %1059 = vst.msk [vmem:[#allocation5 + $0x78] sm:$0xff] %vm3075_vm14, %v1043_v52 }
 0x312   :  { %v816_v1 = vpop.xlane.xlu0 %815 }
 0x313   :  { %v841_v9 = vadd.f32 %v816_v1, %v793_v48 }
 0x315   :  { %858 = vst.msk [vmem:[#allocation3 + $0x30] sm:$0xff] %vm3076_vm9, %v841_v9 }
 0x316   :  { %v832_v50 = vpop.xlane.xlu0 %831 }
 0x317   :  { %v849_v61 = vadd.f32 %v832_v50, %v801_v46 }
 0x319   :  { %866 = vst.msk [vmem:[#allocation3 + $0x70] sm:$0xff] %vm3077_vm10, %v849_v61 }
 0x31a   :  { %v1025_v12 = vpop.xlane.xlu0 %1024 }
 0x31b   :  { %v1042_v63 = vadd.f32 %v1025_v12, %v994_v19 }
 0x31d   :  { %1058 = vst.msk [vmem:[#allocation5 + $0x70] sm:$0xff] %vm3078_vm1, %v1042_v63 }
 0x31e   :  { %1515 = vsyncpa [#allocation7], 1 }

</bundles_post_ra>
